<compile_context>
chip_gen: v6e
topology: v6e:2x2x1
jax: 0.10.0
libtpu: 0.0.40
codegen_flags: <defaults>
</compile_context>

<pallas_src>
import math

import jax
import jax.numpy as jnp
from jax.experimental import pallas as pl
from jax.experimental.pallas import tpu as pltpu

# ---- small GPT-2-like config ----
VOCAB = 128
N_POS = 64
D_MODEL = 32
N_HEAD = 4
D_HEAD = D_MODEL // N_HEAD
N_LAYER = 2
D_FF = 4 * D_MODEL          # 128 -> lane-dense MLP intermediate, never leaves vregs
B = 2                       # batch
S = 16                      # token sequence length (maxlen after padding)
W = 8                       # number of word-boundary indices ('index' pooling)
LN_EPS = 1e-5


def _gelu_new(x):
    # GPT-2 "gelu_new" (tanh approximation) — tanh maps to the EUP slot.
    return 0.5 * x * (1.0 + jnp.tanh(0.7978845608028654 * (x + 0.044715 * x * x * x)))


def _layernorm(x, g, b):
    mu = jnp.mean(x, axis=-1, keepdims=True)
    var = jnp.mean(jnp.square(x - mu), axis=-1, keepdims=True)
    return (x - mu) * jax.lax.rsqrt(var + LN_EPS) * g + b


# ---------------- fused Pallas kernel (whole forward for one batch element) ----------------

def _fused_gpt2_kernel(
    bounds_ref,                      # (B, W) int32 — SMEM (scalar prefetch)
    h_ref,                           # (1, S, D) f32 — token+pos embeddings for this batch element
    mask_ref,                        # (1, 1, S) int32 — key/padding mask for this batch element
    ln1_g_ref, ln1_b_ref,            # (L, 1, D) f32
    w_attn_ref, b_attn_ref,          # (L, D, 3D) bf16 (Q cols pre-scaled), (L, 1, 3D) f32
    w_proj_ref, b_proj_ref,          # (L, D, D) bf16,  (L, 1, D) f32
    ln2_g_ref, ln2_b_ref,            # (L, 1, D) f32
    w_fc_ref, b_fc_ref,              # (L, D, DFF) bf16, (L, 1, DFF) f32
    w_fc2_ref, b_fc2_ref,            # (L, DFF, D) bf16, (L, 1, D) f32
    lnf_g_ref, lnf_b_ref,            # (1, D) f32
    o_ref,                           # (1, 1, W*D) f32 — lane-dense pooled output row
):
    b = pl.program_id(0)
    h = h_ref[0]                                             # (S, D) f32 residual stream

    # Combined causal + key-padding mask, built ONCE and reused by every layer.
    # NOTE: padded query rows still attend to valid earlier keys (matches HF GPT-2 behaviour);
    # those rows are never gathered by the 'index' pooling below.
    key_ok = mask_ref[0] > 0                                 # (1, S)
    qi = jax.lax.broadcasted_iota(jnp.int32, (S, S), 0)
    ki = jax.lax.broadcasted_iota(jnp.int32, (S, S), 1)
    ok = (ki <= qi) & key_ok                                 # (S, S)
    neg = jnp.float32(-1e9)

    for l in range(N_LAYER):                                 # static unroll, weights stay in VMEM
        # ---- attention: LN1 -> QKV -> per-head masked attention -> proj -> residual ----
        a_in = _layernorm(h, ln1_g_ref[l], ln1_b_ref[l])
        qkv = jnp.dot(a_in.astype(jnp.bfloat16), w_attn_ref[l],
                      preferred_element_type=jnp.float32) + b_attn_ref[l]       # (S, 3D) f32
        q16 = qkv[:, :D_MODEL].astype(jnp.bfloat16)                             # (S, D)
        # one K transpose per layer; per-head slices of K^T are sublane-aligned
        kt16 = qkv[:, D_MODEL:2 * D_MODEL].T.astype(jnp.bfloat16)               # (D, S)
        v16 = qkv[:, 2 * D_MODEL:].astype(jnp.bfloat16)                         # (S, D)

        heads = []
        for hd in range(N_HEAD):
            q_h = q16[:, hd * D_HEAD:(hd + 1) * D_HEAD]                         # (S, Dh)
            kt_h = kt16[hd * D_HEAD:(hd + 1) * D_HEAD, :]                       # (Dh, S)
            v_h = v16[:, hd * D_HEAD:(hd + 1) * D_HEAD]                         # (S, Dh)
            sc = jnp.dot(q_h, kt_h, preferred_element_type=jnp.float32)         # scale in Wq
            sc = jnp.where(ok, sc, neg)
            sc = sc - jnp.max(sc, axis=-1, keepdims=True)
            p = jnp.exp(sc)
            p = p * pl.reciprocal(jnp.sum(p, axis=-1, keepdims=True), approx=True)
            heads.append(jnp.dot(p.astype(jnp.bfloat16), v_h,
                                 preferred_element_type=jnp.float32))           # (S, Dh)
        attn = jnp.concatenate(heads, axis=-1)                                  # (S, D) f32
        h = h + jnp.dot(attn.astype(jnp.bfloat16), w_proj_ref[l],
                        preferred_element_type=jnp.float32) + b_proj_ref[l]

        # ---- MLP: LN2 -> fc -> gelu_new -> fc2 -> residual (128-wide act never hits HBM) ----
        m_in = _layernorm(h, ln2_g_ref[l], ln2_b_ref[l])
        f = _gelu_new(jnp.dot(m_in.astype(jnp.bfloat16), w_fc_ref[l],
                              preferred_element_type=jnp.float32) + b_fc_ref[l])  # (S, DFF)
        h = h + jnp.dot(f.astype(jnp.bfloat16), w_fc2_ref[l],
                        preferred_element_type=jnp.float32) + b_fc2_ref[l]

    # final LayerNorm -> hidden_states[-1] for this batch element
    seq = _layernorm(h, lnf_g_ref[...], lnf_b_ref[...])                          # (S, D) f32

    # pooling == 'index': one-hot (W,S) @ seq (S,D) — exact gather done on the (idle) MXU.
    # Indices are clamped to S-1, so an out-of-range bound can never read OOB VMEM.
    row = jax.lax.broadcasted_iota(jnp.int32, (W, S), 0)
    col = jax.lax.broadcasted_iota(jnp.int32, (W, S), 1)
    onehot = jnp.zeros((W, S), jnp.float32)
    for w in range(W):
        idx = jnp.clip(bounds_ref[b, w], 0, S - 1)
        onehot = jnp.where((row == w) & (col == idx), jnp.float32(1.0), onehot)
    pooled = jnp.dot(onehot, seq, preferred_element_type=jnp.float32)            # (W, D) exact

    # single lane-dense store: lay the W rows end-to-end along lanes -> (1, W*D) = (1, 256)
    flat = jnp.concatenate([pooled[w:w + 1, :] for w in range(W)], axis=-1)      # (1, W*D)
    o_ref[0] = flat


# ---------------- parameters ----------------

def init_params(key):
    keys = jax.random.split(key, 2 + N_LAYER)

    def nrm(k, shape):
        return 0.02 * jax.random.normal(k, shape, jnp.float32)

    params = {
        "wte": nrm(keys[0], (VOCAB, D_MODEL)),
        "wpe": nrm(keys[1], (N_POS, D_MODEL)),
        "ln_f_g": jnp.ones((D_MODEL,), jnp.float32),
        "ln_f_b": jnp.zeros((D_MODEL,), jnp.float32),
        "layers": [],
    }
    for i in range(N_LAYER):
        lk = jax.random.split(keys[2 + i], 4)
        params["layers"].append({
            "ln1_g": jnp.ones((D_MODEL,), jnp.float32),
            "ln1_b": jnp.zeros((D_MODEL,), jnp.float32),
            "w_attn": nrm(lk[0], (D_MODEL, 3 * D_MODEL)),
            "b_attn": jnp.zeros((3 * D_MODEL,), jnp.float32),
            "w_proj": nrm(lk[1], (D_MODEL, D_MODEL)),
            "b_proj": jnp.zeros((D_MODEL,), jnp.float32),
            "ln2_g": jnp.ones((D_MODEL,), jnp.float32),
            "ln2_b": jnp.zeros((D_MODEL,), jnp.float32),
            "w_fc": nrm(lk[2], (D_MODEL, D_FF)),
            "b_fc": jnp.zeros((D_FF,), jnp.float32),
            "w_fc2": nrm(lk[3], (D_FF, D_MODEL)),
            "b_fc2": jnp.zeros((D_MODEL,), jnp.float32),
        })
    return params


# ---------------- forward (== GPT2_encoder.forward, pooling='index', gen_with_gpt=False) ----------------

def gpt2_encoder_forward(params, input_ids, input_masks, input_bounds):
    # TODO(synk): tokenizer / string preprocessing (tokenize_wo_slots, get_input_ids,
    # get_wordbound_idx) has no Pallas equivalent; we take its integer outputs as inputs.
    pos_ids = jnp.arange(S)
    h0 = params["wte"][input_ids] + params["wpe"][pos_ids][None, :, :]      # (B, S, D) — XLA gather
    h0 = h0.astype(jnp.float32)
    mask3 = input_masks.astype(jnp.int32).reshape(B, 1, S)

    L = params["layers"]

    def stk(name, shape, dtype=jnp.float32):
        return jnp.stack([lp[name] for lp in L]).reshape(shape).astype(dtype)

    # Fold the 1/sqrt(d_head) attention scale into the Q columns of w_attn and b_attn (free).
    scale = jnp.float32(1.0 / math.sqrt(D_HEAD))
    qkv_scale = jnp.concatenate([jnp.full((D_MODEL,), scale, jnp.float32),
                                 jnp.ones((2 * D_MODEL,), jnp.float32)])

    ln1_g = stk("ln1_g", (N_LAYER, 1, D_MODEL))
    ln1_b = stk("ln1_b", (N_LAYER, 1, D_MODEL))
    w_attn = (stk("w_attn", (N_LAYER, D_MODEL, 3 * D_MODEL)) * qkv_scale).astype(jnp.bfloat16)
    b_attn = stk("b_attn", (N_LAYER, 1, 3 * D_MODEL)) * qkv_scale
    w_proj = stk("w_proj", (N_LAYER, D_MODEL, D_MODEL), jnp.bfloat16)
    b_proj = stk("b_proj", (N_LAYER, 1, D_MODEL))
    ln2_g = stk("ln2_g", (N_LAYER, 1, D_MODEL))
    ln2_b = stk("ln2_b", (N_LAYER, 1, D_MODEL))
    w_fc = stk("w_fc", (N_LAYER, D_MODEL, D_FF), jnp.bfloat16)
    b_fc = stk("b_fc", (N_LAYER, 1, D_FF))
    w_fc2 = stk("w_fc2", (N_LAYER, D_FF, D_MODEL), jnp.bfloat16)
    b_fc2 = stk("b_fc2", (N_LAYER, 1, D_MODEL))
    lnf_g = params["ln_f_g"].reshape(1, D_MODEL)
    lnf_b = params["ln_f_b"].reshape(1, D_MODEL)

    def whole(arr):
        nd = arr.ndim
        return pl.BlockSpec(arr.shape, lambda b, bnd, _nd=nd: (0,) * _nd)

    grid_spec = pltpu.PrefetchScalarGridSpec(
        num_scalar_prefetch=1,                         # input_bounds -> SMEM
        grid=(B,),                                     # one program per batch element (v7x: 1/TC)
        in_specs=[
            pl.BlockSpec((1, S, D_MODEL), lambda b, bnd: (b, 0, 0)),     # embeddings
            pl.BlockSpec((1, 1, S), lambda b, bnd: (b, 0, 0)),           # padding mask
            whole(ln1_g), whole(ln1_b), whole(w_attn), whole(b_attn),
            whole(w_proj), whole(b_proj), whole(ln2_g), whole(ln2_b),
            whole(w_fc), whole(b_fc), whole(w_fc2), whole(b_fc2),
            whole(lnf_g), whole(lnf_b),
        ],
        # lane-dense output: (1, 1, W*D) = (1, 1, 256) block -> unmasked 256-lane stores
        out_specs=pl.BlockSpec((1, 1, W * D_MODEL), lambda b, bnd: (b, 0, 0)),
    )

    out_flat = pl.pallas_call(
        _fused_gpt2_kernel,
        out_shape=jax.ShapeDtypeStruct((B, 1, W * D_MODEL), jnp.float32),
        grid_spec=grid_spec,
        compiler_params=pltpu.CompilerParams(dimension_semantics=("parallel",)),
    )(input_bounds, h0, mask3,
      ln1_g, ln1_b, w_attn, b_attn, w_proj, b_proj,
      ln2_g, ln2_b, w_fc, b_fc, w_fc2, b_fc2, lnf_g, lnf_b)

    newhidden = out_flat.reshape(B, W, D_MODEL)        # back to (B, W, D) gather semantics
    newquery = None                                    # gen_with_gpt = False path
    return newhidden, newquery


if __name__ == "__main__":
    key = jax.random.PRNGKey(0)
    kp, kid, kb0, kb1 = jax.random.split(key, 4)
    params = init_params(kp)

    # synthetic "tokenized" inputs (deterministic)
    input_ids = jax.random.randint(kid, (B, S), 0, VOCAB, dtype=jnp.int32)
    lengths = jnp.array([S, S - 4], dtype=jnp.int32)
    input_masks = (jnp.arange(S)[None, :] < lengths[:, None]).astype(jnp.int32)
    # word-boundary token indices within each utterance's valid span ('index' pooling)
    input_bounds = jnp.stack([
        jnp.sort(jax.random.randint(kb0, (W,), 0, int(lengths[0]), dtype=jnp.int32)),
        jnp.sort(jax.random.randint(kb1, (W,), 0, int(lengths[1]), dtype=jnp.int32)),
    ]).astype(jnp.int32)

    newhidden, newquery = jax.jit(gpt2_encoder_forward)(
        params, input_ids, input_masks, input_bounds)
    jax.block_until_ready(newhidden)
    assert newhidden.shape == (B, W, D_MODEL)
    assert newquery is None
    print("KERNEL_OK")
</pallas_src>

<mosaic_0001>
module attributes {stable_mosaic.version = 11 : i64} {
  func.func @_fused_gpt2_kernel(%arg0: i32, %arg1: memref<2x8xi32, #tpu.memory_space<smem>>, %arg2: memref<1x16x32xf32, #tpu.memory_space<vmem>>, %arg3: memref<1x1x16xi32, #tpu.memory_space<vmem>>, %arg4: memref<2x1x32xf32, #tpu.memory_space<vmem>>, %arg5: memref<2x1x32xf32, #tpu.memory_space<vmem>>, %arg6: memref<2x32x96xbf16, #tpu.memory_space<vmem>>, %arg7: memref<2x1x96xf32, #tpu.memory_space<vmem>>, %arg8: memref<2x32x32xbf16, #tpu.memory_space<vmem>>, %arg9: memref<2x1x32xf32, #tpu.memory_space<vmem>>, %arg10: memref<2x1x32xf32, #tpu.memory_space<vmem>>, %arg11: memref<2x1x32xf32, #tpu.memory_space<vmem>>, %arg12: memref<2x32x128xbf16, #tpu.memory_space<vmem>>, %arg13: memref<2x1x128xf32, #tpu.memory_space<vmem>>, %arg14: memref<2x128x32xbf16, #tpu.memory_space<vmem>>, %arg15: memref<2x1x32xf32, #tpu.memory_space<vmem>>, %arg16: memref<1x32xf32, #tpu.memory_space<vmem>>, %arg17: memref<1x32xf32, #tpu.memory_space<vmem>>, %arg18: memref<1x1x256xf32, #tpu.memory_space<vmem>>) attributes {dimension_semantics = [#tpu.dimension_semantics<parallel>], iteration_bounds = array<i64: 2>, scalar_prefetch = 1 : i64, scratch_operands = 0 : i64, tpu.core_type = #tpu.core_type<tc>, window_params = [{transform_indices = @transform_0, window_bounds = array<i64: 1, 16, 32>}, {transform_indices = @transform_1, window_bounds = array<i64: 1, 1, 16>}, {pipeline_mode = #tpu.pipeline_mode<synchronous>, transform_indices = @transform_2, window_bounds = array<i64: 2, 1, 32>}, {pipeline_mode = #tpu.pipeline_mode<synchronous>, transform_indices = @transform_3, window_bounds = array<i64: 2, 1, 32>}, {pipeline_mode = #tpu.pipeline_mode<synchronous>, transform_indices = @transform_4, window_bounds = array<i64: 2, 32, 96>}, {pipeline_mode = #tpu.pipeline_mode<synchronous>, transform_indices = @transform_5, window_bounds = array<i64: 2, 1, 96>}, {pipeline_mode = #tpu.pipeline_mode<synchronous>, transform_indices = @transform_6, window_bounds = array<i64: 2, 32, 32>}, {pipeline_mode = #tpu.pipeline_mode<synchronous>, transform_indices = @transform_7, window_bounds = array<i64: 2, 1, 32>}, {pipeline_mode = #tpu.pipeline_mode<synchronous>, transform_indices = @transform_8, window_bounds = array<i64: 2, 1, 32>}, {pipeline_mode = #tpu.pipeline_mode<synchronous>, transform_indices = @transform_9, window_bounds = array<i64: 2, 1, 32>}, {pipeline_mode = #tpu.pipeline_mode<synchronous>, transform_indices = @transform_10, window_bounds = array<i64: 2, 32, 128>}, {pipeline_mode = #tpu.pipeline_mode<synchronous>, transform_indices = @transform_11, window_bounds = array<i64: 2, 1, 128>}, {pipeline_mode = #tpu.pipeline_mode<synchronous>, transform_indices = @transform_12, window_bounds = array<i64: 2, 128, 32>}, {pipeline_mode = #tpu.pipeline_mode<synchronous>, transform_indices = @transform_13, window_bounds = array<i64: 2, 1, 32>}, {pipeline_mode = #tpu.pipeline_mode<synchronous>, transform_indices = @transform_14, window_bounds = array<i64: 1, 32>}, {pipeline_mode = #tpu.pipeline_mode<synchronous>, transform_indices = @transform_15, window_bounds = array<i64: 1, 32>}, {transform_indices = @transform_16, window_bounds = array<i64: 1, 1, 256>}]} {
    %c0 = arith.constant 0 : index
    %c0_0 = arith.constant 0 : index
    %c0_1 = arith.constant 0 : index
    %0 = vector.load %arg2[%c0, %c0_0, %c0_1] : memref<1x16x32xf32, #tpu.memory_space<vmem>>, vector<1x16x32xf32>
    %1 = vector.shape_cast %0 : vector<1x16x32xf32> to vector<16x32xf32>
    %c0_2 = arith.constant 0 : index
    %c0_3 = arith.constant 0 : index
    %c0_4 = arith.constant 0 : index
    %2 = vector.load %arg3[%c0_2, %c0_3, %c0_4] : memref<1x1x16xi32, #tpu.memory_space<vmem>>, vector<1x1x16xi32>
    %3 = vector.shape_cast %2 : vector<1x1x16xi32> to vector<1x16xi32>
    %c0_i32 = arith.constant 0 : i32
    %4 = vector.broadcast %c0_i32 : i32 to vector<1x16xi32>
    %5 = arith.cmpi sgt, %3, %4 : vector<1x16xi32>
    %6 = tpu.iota {dimensions = array<i32: 0>} : vector<16x16xi32>
    %7 = tpu.iota {dimensions = array<i32: 1>} : vector<16x16xi32>
    %8 = arith.cmpi sle, %7, %6 : vector<16x16xi32>
    %9 = vector.broadcast %5 : vector<1x16xi1> to vector<16x16xi1>
    %10 = arith.andi %8, %9 : vector<16x16xi1>
    %c0_5 = arith.constant 0 : index
    %c0_6 = arith.constant 0 : index
    %c0_7 = arith.constant 0 : index
    %11 = vector.load %arg4[%c0_5, %c0_6, %c0_7] : memref<2x1x32xf32, #tpu.memory_space<vmem>>, vector<1x1x32xf32>
    %12 = vector.shape_cast %11 : vector<1x1x32xf32> to vector<1x32xf32>
    %c0_8 = arith.constant 0 : index
    %c0_9 = arith.constant 0 : index
    %c0_10 = arith.constant 0 : index
    %13 = vector.load %arg5[%c0_8, %c0_9, %c0_10] : memref<2x1x32xf32, #tpu.memory_space<vmem>>, vector<1x1x32xf32>
    %14 = vector.shape_cast %13 : vector<1x1x32xf32> to vector<1x32xf32>
    %cst = arith.constant dense<0.000000e+00> : vector<16xf32>
    %15 = vector.multi_reduction <add>, %1, %cst [1] : vector<16x32xf32> to vector<16xf32>
    %16 = vector.shape_cast %15 : vector<16xf32> to vector<16x1xf32>
    %cst_11 = arith.constant 3.200000e+01 : f32
    %17 = vector.broadcast %cst_11 : f32 to vector<16x1xf32>
    %18 = arith.divf %16, %17 : vector<16x1xf32>
    %19 = vector.broadcast %18 : vector<16x1xf32> to vector<16x32xf32>
    %20 = arith.subf %1, %19 : vector<16x32xf32>
    %21 = arith.mulf %20, %20 : vector<16x32xf32>
    %cst_12 = arith.constant dense<0.000000e+00> : vector<16xf32>
    %22 = vector.multi_reduction <add>, %21, %cst_12 [1] : vector<16x32xf32> to vector<16xf32>
    %23 = vector.shape_cast %22 : vector<16xf32> to vector<16x1xf32>
    %cst_13 = arith.constant 3.200000e+01 : f32
    %24 = vector.broadcast %cst_13 : f32 to vector<16x1xf32>
    %25 = arith.divf %23, %24 : vector<16x1xf32>
    %26 = vector.broadcast %18 : vector<16x1xf32> to vector<16x32xf32>
    %27 = arith.subf %1, %26 : vector<16x32xf32>
    %cst_14 = arith.constant 9.99999974E-6 : f32
    %28 = vector.broadcast %cst_14 : f32 to vector<16x1xf32>
    %29 = arith.addf %25, %28 : vector<16x1xf32>
    %30 = math.rsqrt %29 : vector<16x1xf32>
    %31 = vector.broadcast %30 : vector<16x1xf32> to vector<16x32xf32>
    %32 = arith.mulf %27, %31 : vector<16x32xf32>
    %33 = vector.broadcast %12 : vector<1x32xf32> to vector<16x32xf32>
    %34 = arith.mulf %32, %33 : vector<16x32xf32>
    %35 = vector.broadcast %14 : vector<1x32xf32> to vector<16x32xf32>
    %36 = arith.addf %34, %35 : vector<16x32xf32>
    %37 = arith.truncf %36 : vector<16x32xf32> to vector<16x32xbf16>
    %c0_15 = arith.constant 0 : index
    %c0_16 = arith.constant 0 : index
    %c0_17 = arith.constant 0 : index
    %38 = vector.load %arg6[%c0_15, %c0_16, %c0_17] : memref<2x32x96xbf16, #tpu.memory_space<vmem>>, vector<1x32x96xbf16>
    %39 = vector.shape_cast %38 : vector<1x32x96xbf16> to vector<32x96xbf16>
    %cst_18 = arith.constant dense<0.000000e+00> : vector<16x96xf32>
    %40 = tpu.matmul %37, %39, %cst_18 {dimension_numbers = #tpu.dot_dimension_numbers<[1], [0], [0], [1], [0, 0, 1, 1], [], []>} : vector<16x32xbf16>, vector<32x96xbf16>, vector<16x96xf32> -> vector<16x96xf32>
    %c0_19 = arith.constant 0 : index
    %c0_20 = arith.constant 0 : index
    %c0_21 = arith.constant 0 : index
    %41 = vector.load %arg7[%c0_19, %c0_20, %c0_21] : memref<2x1x96xf32, #tpu.memory_space<vmem>>, vector<1x1x96xf32>
    %42 = vector.shape_cast %41 : vector<1x1x96xf32> to vector<1x96xf32>
    %43 = vector.broadcast %42 : vector<1x96xf32> to vector<16x96xf32>
    %44 = arith.addf %40, %43 : vector<16x96xf32>
    %45 = vector.extract_strided_slice %44 {offsets = [0, 0], sizes = [16, 32], strides = [1, 1]} : vector<16x96xf32> to vector<16x32xf32>
    %46 = arith.truncf %45 : vector<16x32xf32> to vector<16x32xbf16>
    %47 = vector.extract_strided_slice %44 {offsets = [0, 32], sizes = [16, 32], strides = [1, 1]} : vector<16x96xf32> to vector<16x32xf32>
    %48 = tpu.transpose %47, [1, 0] : vector<16x32xf32> -> vector<32x16xf32>
    %49 = arith.truncf %48 : vector<32x16xf32> to vector<32x16xbf16>
    %50 = vector.extract_strided_slice %44 {offsets = [0, 64], sizes = [16, 32], strides = [1, 1]} : vector<16x96xf32> to vector<16x32xf32>
    %51 = arith.truncf %50 : vector<16x32xf32> to vector<16x32xbf16>
    %52 = vector.extract_strided_slice %46 {offsets = [0, 0], sizes = [16, 8], strides = [1, 1]} : vector<16x32xbf16> to vector<16x8xbf16>
    %53 = vector.extract_strided_slice %49 {offsets = [0, 0], sizes = [8, 16], strides = [1, 1]} : vector<32x16xbf16> to vector<8x16xbf16>
    %54 = vector.extract_strided_slice %51 {offsets = [0, 0], sizes = [16, 8], strides = [1, 1]} : vector<16x32xbf16> to vector<16x8xbf16>
    %cst_22 = arith.constant dense<0.000000e+00> : vector<16x16xf32>
    %55 = tpu.matmul %52, %53, %cst_22 {dimension_numbers = #tpu.dot_dimension_numbers<[1], [0], [0], [1], [0, 0, 1, 1], [], []>} : vector<16x8xbf16>, vector<8x16xbf16>, vector<16x16xf32> -> vector<16x16xf32>
    %cst_23 = arith.constant -1.000000e+09 : f32
    %56 = vector.broadcast %cst_23 : f32 to vector<16x16xf32>
    %57 = arith.select %10, %55, %56 : vector<16x16xi1>, vector<16x16xf32>
    %cst_24 = arith.constant dense<0xFF800000> : vector<16xf32>
    %58 = vector.multi_reduction <maximumf>, %57, %cst_24 [1] : vector<16x16xf32> to vector<16xf32>
    %59 = vector.shape_cast %58 : vector<16xf32> to vector<16x1xf32>
    %60 = vector.broadcast %59 : vector<16x1xf32> to vector<16x16xf32>
    %61 = arith.subf %57, %60 : vector<16x16xf32>
    %62 = math.exp %61 : vector<16x16xf32>
    %cst_25 = arith.constant dense<0.000000e+00> : vector<16xf32>
    %63 = vector.multi_reduction <add>, %62, %cst_25 [1] : vector<16x16xf32> to vector<16xf32>
    %64 = vector.shape_cast %63 : vector<16xf32> to vector<16x1xf32>
    %65 = tpu.reciprocal %64 {approx = true} : vector<16x1xf32> -> vector<16x1xf32>
    %66 = vector.broadcast %65 : vector<16x1xf32> to vector<16x16xf32>
    %67 = arith.mulf %62, %66 : vector<16x16xf32>
    %68 = arith.truncf %67 : vector<16x16xf32> to vector<16x16xbf16>
    %cst_26 = arith.constant dense<0.000000e+00> : vector<16x8xf32>
    %69 = tpu.matmul %68, %54, %cst_26 {dimension_numbers = #tpu.dot_dimension_numbers<[1], [0], [0], [1], [0, 0, 1, 1], [], []>} : vector<16x16xbf16>, vector<16x8xbf16>, vector<16x8xf32> -> vector<16x8xf32>
    %70 = vector.extract_strided_slice %46 {offsets = [0, 8], sizes = [16, 8], strides = [1, 1]} : vector<16x32xbf16> to vector<16x8xbf16>
    %71 = vector.extract_strided_slice %49 {offsets = [8, 0], sizes = [8, 16], strides = [1, 1]} : vector<32x16xbf16> to vector<8x16xbf16>
    %72 = vector.extract_strided_slice %51 {offsets = [0, 8], sizes = [16, 8], strides = [1, 1]} : vector<16x32xbf16> to vector<16x8xbf16>
    %cst_27 = arith.constant dense<0.000000e+00> : vector<16x16xf32>
    %73 = tpu.matmul %70, %71, %cst_27 {dimension_numbers = #tpu.dot_dimension_numbers<[1], [0], [0], [1], [0, 0, 1, 1], [], []>} : vector<16x8xbf16>, vector<8x16xbf16>, vector<16x16xf32> -> vector<16x16xf32>
    %cst_28 = arith.constant -1.000000e+09 : f32
    %74 = vector.broadcast %cst_28 : f32 to vector<16x16xf32>
    %75 = arith.select %10, %73, %74 : vector<16x16xi1>, vector<16x16xf32>
    %cst_29 = arith.constant dense<0xFF800000> : vector<16xf32>
    %76 = vector.multi_reduction <maximumf>, %75, %cst_29 [1] : vector<16x16xf32> to vector<16xf32>
    %77 = vector.shape_cast %76 : vector<16xf32> to vector<16x1xf32>
    %78 = vector.broadcast %77 : vector<16x1xf32> to vector<16x16xf32>
    %79 = arith.subf %75, %78 : vector<16x16xf32>
    %80 = math.exp %79 : vector<16x16xf32>
    %cst_30 = arith.constant dense<0.000000e+00> : vector<16xf32>
    %81 = vector.multi_reduction <add>, %80, %cst_30 [1] : vector<16x16xf32> to vector<16xf32>
    %82 = vector.shape_cast %81 : vector<16xf32> to vector<16x1xf32>
    %83 = tpu.reciprocal %82 {approx = true} : vector<16x1xf32> -> vector<16x1xf32>
    %84 = vector.broadcast %83 : vector<16x1xf32> to vector<16x16xf32>
    %85 = arith.mulf %80, %84 : vector<16x16xf32>
    %86 = arith.truncf %85 : vector<16x16xf32> to vector<16x16xbf16>
    %cst_31 = arith.constant dense<0.000000e+00> : vector<16x8xf32>
    %87 = tpu.matmul %86, %72, %cst_31 {dimension_numbers = #tpu.dot_dimension_numbers<[1], [0], [0], [1], [0, 0, 1, 1], [], []>} : vector<16x16xbf16>, vector<16x8xbf16>, vector<16x8xf32> -> vector<16x8xf32>
    %88 = vector.extract_strided_slice %46 {offsets = [0, 16], sizes = [16, 8], strides = [1, 1]} : vector<16x32xbf16> to vector<16x8xbf16>
    %89 = vector.extract_strided_slice %49 {offsets = [16, 0], sizes = [8, 16], strides = [1, 1]} : vector<32x16xbf16> to vector<8x16xbf16>
    %90 = vector.extract_strided_slice %51 {offsets = [0, 16], sizes = [16, 8], strides = [1, 1]} : vector<16x32xbf16> to vector<16x8xbf16>
    %cst_32 = arith.constant dense<0.000000e+00> : vector<16x16xf32>
    %91 = tpu.matmul %88, %89, %cst_32 {dimension_numbers = #tpu.dot_dimension_numbers<[1], [0], [0], [1], [0, 0, 1, 1], [], []>} : vector<16x8xbf16>, vector<8x16xbf16>, vector<16x16xf32> -> vector<16x16xf32>
    %cst_33 = arith.constant -1.000000e+09 : f32
    %92 = vector.broadcast %cst_33 : f32 to vector<16x16xf32>
    %93 = arith.select %10, %91, %92 : vector<16x16xi1>, vector<16x16xf32>
    %cst_34 = arith.constant dense<0xFF800000> : vector<16xf32>
    %94 = vector.multi_reduction <maximumf>, %93, %cst_34 [1] : vector<16x16xf32> to vector<16xf32>
    %95 = vector.shape_cast %94 : vector<16xf32> to vector<16x1xf32>
    %96 = vector.broadcast %95 : vector<16x1xf32> to vector<16x16xf32>
    %97 = arith.subf %93, %96 : vector<16x16xf32>
    %98 = math.exp %97 : vector<16x16xf32>
    %cst_35 = arith.constant dense<0.000000e+00> : vector<16xf32>
    %99 = vector.multi_reduction <add>, %98, %cst_35 [1] : vector<16x16xf32> to vector<16xf32>
    %100 = vector.shape_cast %99 : vector<16xf32> to vector<16x1xf32>
    %101 = tpu.reciprocal %100 {approx = true} : vector<16x1xf32> -> vector<16x1xf32>
    %102 = vector.broadcast %101 : vector<16x1xf32> to vector<16x16xf32>
    %103 = arith.mulf %98, %102 : vector<16x16xf32>
    %104 = arith.truncf %103 : vector<16x16xf32> to vector<16x16xbf16>
    %cst_36 = arith.constant dense<0.000000e+00> : vector<16x8xf32>
    %105 = tpu.matmul %104, %90, %cst_36 {dimension_numbers = #tpu.dot_dimension_numbers<[1], [0], [0], [1], [0, 0, 1, 1], [], []>} : vector<16x16xbf16>, vector<16x8xbf16>, vector<16x8xf32> -> vector<16x8xf32>
    %106 = vector.extract_strided_slice %46 {offsets = [0, 24], sizes = [16, 8], strides = [1, 1]} : vector<16x32xbf16> to vector<16x8xbf16>
    %107 = vector.extract_strided_slice %49 {offsets = [24, 0], sizes = [8, 16], strides = [1, 1]} : vector<32x16xbf16> to vector<8x16xbf16>
    %108 = vector.extract_strided_slice %51 {offsets = [0, 24], sizes = [16, 8], strides = [1, 1]} : vector<16x32xbf16> to vector<16x8xbf16>
    %cst_37 = arith.constant dense<0.000000e+00> : vector<16x16xf32>
    %109 = tpu.matmul %106, %107, %cst_37 {dimension_numbers = #tpu.dot_dimension_numbers<[1], [0], [0], [1], [0, 0, 1, 1], [], []>} : vector<16x8xbf16>, vector<8x16xbf16>, vector<16x16xf32> -> vector<16x16xf32>
    %cst_38 = arith.constant -1.000000e+09 : f32
    %110 = vector.broadcast %cst_38 : f32 to vector<16x16xf32>
    %111 = arith.select %10, %109, %110 : vector<16x16xi1>, vector<16x16xf32>
    %cst_39 = arith.constant dense<0xFF800000> : vector<16xf32>
    %112 = vector.multi_reduction <maximumf>, %111, %cst_39 [1] : vector<16x16xf32> to vector<16xf32>
    %113 = vector.shape_cast %112 : vector<16xf32> to vector<16x1xf32>
    %114 = vector.broadcast %113 : vector<16x1xf32> to vector<16x16xf32>
    %115 = arith.subf %111, %114 : vector<16x16xf32>
    %116 = math.exp %115 : vector<16x16xf32>
    %cst_40 = arith.constant dense<0.000000e+00> : vector<16xf32>
    %117 = vector.multi_reduction <add>, %116, %cst_40 [1] : vector<16x16xf32> to vector<16xf32>
    %118 = vector.shape_cast %117 : vector<16xf32> to vector<16x1xf32>
    %119 = tpu.reciprocal %118 {approx = true} : vector<16x1xf32> -> vector<16x1xf32>
    %120 = vector.broadcast %119 : vector<16x1xf32> to vector<16x16xf32>
    %121 = arith.mulf %116, %120 : vector<16x16xf32>
    %122 = arith.truncf %121 : vector<16x16xf32> to vector<16x16xbf16>
    %cst_41 = arith.constant dense<0.000000e+00> : vector<16x8xf32>
    %123 = tpu.matmul %122, %108, %cst_41 {dimension_numbers = #tpu.dot_dimension_numbers<[1], [0], [0], [1], [0, 0, 1, 1], [], []>} : vector<16x16xbf16>, vector<16x8xbf16>, vector<16x8xf32> -> vector<16x8xf32>
    %124 = tpu.concatenate %69, %87, %105, %123 in 1 : vector<16x8xf32>, vector<16x8xf32>, vector<16x8xf32>, vector<16x8xf32> -> vector<16x32xf32>
    %125 = arith.truncf %124 : vector<16x32xf32> to vector<16x32xbf16>
    %c0_42 = arith.constant 0 : index
    %c0_43 = arith.constant 0 : index
    %c0_44 = arith.constant 0 : index
    %126 = vector.load %arg8[%c0_42, %c0_43, %c0_44] : memref<2x32x32xbf16, #tpu.memory_space<vmem>>, vector<1x32x32xbf16>
    %127 = vector.shape_cast %126 : vector<1x32x32xbf16> to vector<32x32xbf16>
    %cst_45 = arith.constant dense<0.000000e+00> : vector<16x32xf32>
    %128 = tpu.matmul %125, %127, %cst_45 {dimension_numbers = #tpu.dot_dimension_numbers<[1], [0], [0], [1], [0, 0, 1, 1], [], []>} : vector<16x32xbf16>, vector<32x32xbf16>, vector<16x32xf32> -> vector<16x32xf32>
    %129 = arith.addf %1, %128 : vector<16x32xf32>
    %c0_46 = arith.constant 0 : index
    %c0_47 = arith.constant 0 : index
    %c0_48 = arith.constant 0 : index
    %130 = vector.load %arg9[%c0_46, %c0_47, %c0_48] : memref<2x1x32xf32, #tpu.memory_space<vmem>>, vector<1x1x32xf32>
    %131 = vector.shape_cast %130 : vector<1x1x32xf32> to vector<1x32xf32>
    %132 = vector.broadcast %131 : vector<1x32xf32> to vector<16x32xf32>
    %133 = arith.addf %129, %132 : vector<16x32xf32>
    %c0_49 = arith.constant 0 : index
    %c0_50 = arith.constant 0 : index
    %c0_51 = arith.constant 0 : index
    %134 = vector.load %arg10[%c0_49, %c0_50, %c0_51] : memref<2x1x32xf32, #tpu.memory_space<vmem>>, vector<1x1x32xf32>
    %135 = vector.shape_cast %134 : vector<1x1x32xf32> to vector<1x32xf32>
    %c0_52 = arith.constant 0 : index
    %c0_53 = arith.constant 0 : index
    %c0_54 = arith.constant 0 : index
    %136 = vector.load %arg11[%c0_52, %c0_53, %c0_54] : memref<2x1x32xf32, #tpu.memory_space<vmem>>, vector<1x1x32xf32>
    %137 = vector.shape_cast %136 : vector<1x1x32xf32> to vector<1x32xf32>
    %cst_55 = arith.constant dense<0.000000e+00> : vector<16xf32>
    %138 = vector.multi_reduction <add>, %133, %cst_55 [1] : vector<16x32xf32> to vector<16xf32>
    %139 = vector.shape_cast %138 : vector<16xf32> to vector<16x1xf32>
    %cst_56 = arith.constant 3.200000e+01 : f32
    %140 = vector.broadcast %cst_56 : f32 to vector<16x1xf32>
    %141 = arith.divf %139, %140 : vector<16x1xf32>
    %142 = vector.broadcast %141 : vector<16x1xf32> to vector<16x32xf32>
    %143 = arith.subf %133, %142 : vector<16x32xf32>
    %144 = arith.mulf %143, %143 : vector<16x32xf32>
    %cst_57 = arith.constant dense<0.000000e+00> : vector<16xf32>
    %145 = vector.multi_reduction <add>, %144, %cst_57 [1] : vector<16x32xf32> to vector<16xf32>
    %146 = vector.shape_cast %145 : vector<16xf32> to vector<16x1xf32>
    %cst_58 = arith.constant 3.200000e+01 : f32
    %147 = vector.broadcast %cst_58 : f32 to vector<16x1xf32>
    %148 = arith.divf %146, %147 : vector<16x1xf32>
    %149 = vector.broadcast %141 : vector<16x1xf32> to vector<16x32xf32>
    %150 = arith.subf %133, %149 : vector<16x32xf32>
    %cst_59 = arith.constant 9.99999974E-6 : f32
    %151 = vector.broadcast %cst_59 : f32 to vector<16x1xf32>
    %152 = arith.addf %148, %151 : vector<16x1xf32>
    %153 = math.rsqrt %152 : vector<16x1xf32>
    %154 = vector.broadcast %153 : vector<16x1xf32> to vector<16x32xf32>
    %155 = arith.mulf %150, %154 : vector<16x32xf32>
    %156 = vector.broadcast %135 : vector<1x32xf32> to vector<16x32xf32>
    %157 = arith.mulf %155, %156 : vector<16x32xf32>
    %158 = vector.broadcast %137 : vector<1x32xf32> to vector<16x32xf32>
    %159 = arith.addf %157, %158 : vector<16x32xf32>
    %160 = arith.truncf %159 : vector<16x32xf32> to vector<16x32xbf16>
    %c0_60 = arith.constant 0 : index
    %c0_61 = arith.constant 0 : index
    %c0_62 = arith.constant 0 : index
    %161 = vector.load %arg12[%c0_60, %c0_61, %c0_62] : memref<2x32x128xbf16, #tpu.memory_space<vmem>>, vector<1x32x128xbf16>
    %162 = vector.shape_cast %161 : vector<1x32x128xbf16> to vector<32x128xbf16>
    %cst_63 = arith.constant dense<0.000000e+00> : vector<16x128xf32>
    %163 = tpu.matmul %160, %162, %cst_63 {dimension_numbers = #tpu.dot_dimension_numbers<[1], [0], [0], [1], [0, 0, 1, 1], [], []>} : vector<16x32xbf16>, vector<32x128xbf16>, vector<16x128xf32> -> vector<16x128xf32>
    %c0_64 = arith.constant 0 : index
    %c0_65 = arith.constant 0 : index
    %c0_66 = arith.constant 0 : index
    %164 = vector.load %arg13[%c0_64, %c0_65, %c0_66] : memref<2x1x128xf32, #tpu.memory_space<vmem>>, vector<1x1x128xf32>
    %165 = vector.shape_cast %164 : vector<1x1x128xf32> to vector<1x128xf32>
    %166 = vector.broadcast %165 : vector<1x128xf32> to vector<16x128xf32>
    %167 = arith.addf %163, %166 : vector<16x128xf32>
    %cst_67 = arith.constant 5.000000e-01 : f32
    %168 = vector.broadcast %cst_67 : f32 to vector<16x128xf32>
    %169 = arith.mulf %168, %167 : vector<16x128xf32>
    %cst_68 = arith.constant 4.471500e-02 : f32
    %170 = vector.broadcast %cst_68 : f32 to vector<16x128xf32>
    %171 = arith.mulf %170, %167 : vector<16x128xf32>
    %172 = arith.mulf %171, %167 : vector<16x128xf32>
    %173 = arith.mulf %172, %167 : vector<16x128xf32>
    %174 = arith.addf %167, %173 : vector<16x128xf32>
    %cst_69 = arith.constant 0.797884583 : f32
    %175 = vector.broadcast %cst_69 : f32 to vector<16x128xf32>
    %176 = arith.mulf %175, %174 : vector<16x128xf32>
    %177 = math.tanh %176 : vector<16x128xf32>
    %cst_70 = arith.constant 1.000000e+00 : f32
    %178 = vector.broadcast %cst_70 : f32 to vector<16x128xf32>
    %179 = arith.addf %178, %177 : vector<16x128xf32>
    %180 = arith.mulf %169, %179 : vector<16x128xf32>
    %181 = arith.truncf %180 : vector<16x128xf32> to vector<16x128xbf16>
    %c0_71 = arith.constant 0 : index
    %c0_72 = arith.constant 0 : index
    %c0_73 = arith.constant 0 : index
    %182 = vector.load %arg14[%c0_71, %c0_72, %c0_73] : memref<2x128x32xbf16, #tpu.memory_space<vmem>>, vector<1x128x32xbf16>
    %183 = vector.shape_cast %182 : vector<1x128x32xbf16> to vector<128x32xbf16>
    %cst_74 = arith.constant dense<0.000000e+00> : vector<16x32xf32>
    %184 = tpu.matmul %181, %183, %cst_74 {dimension_numbers = #tpu.dot_dimension_numbers<[1], [0], [0], [1], [0, 0, 1, 1], [], []>} : vector<16x128xbf16>, vector<128x32xbf16>, vector<16x32xf32> -> vector<16x32xf32>
    %185 = arith.addf %133, %184 : vector<16x32xf32>
    %c0_75 = arith.constant 0 : index
    %c0_76 = arith.constant 0 : index
    %c0_77 = arith.constant 0 : index
    %186 = vector.load %arg15[%c0_75, %c0_76, %c0_77] : memref<2x1x32xf32, #tpu.memory_space<vmem>>, vector<1x1x32xf32>
    %187 = vector.shape_cast %186 : vector<1x1x32xf32> to vector<1x32xf32>
    %188 = vector.broadcast %187 : vector<1x32xf32> to vector<16x32xf32>
    %189 = arith.addf %185, %188 : vector<16x32xf32>
    %c1 = arith.constant 1 : index
    %c0_78 = arith.constant 0 : index
    %c0_79 = arith.constant 0 : index
    %190 = vector.load %arg4[%c1, %c0_78, %c0_79] : memref<2x1x32xf32, #tpu.memory_space<vmem>>, vector<1x1x32xf32>
    %191 = vector.shape_cast %190 : vector<1x1x32xf32> to vector<1x32xf32>
    %c1_80 = arith.constant 1 : index
    %c0_81 = arith.constant 0 : index
    %c0_82 = arith.constant 0 : index
    %192 = vector.load %arg5[%c1_80, %c0_81, %c0_82] : memref<2x1x32xf32, #tpu.memory_space<vmem>>, vector<1x1x32xf32>
    %193 = vector.shape_cast %192 : vector<1x1x32xf32> to vector<1x32xf32>
    %cst_83 = arith.constant dense<0.000000e+00> : vector<16xf32>
    %194 = vector.multi_reduction <add>, %189, %cst_83 [1] : vector<16x32xf32> to vector<16xf32>
    %195 = vector.shape_cast %194 : vector<16xf32> to vector<16x1xf32>
    %cst_84 = arith.constant 3.200000e+01 : f32
    %196 = vector.broadcast %cst_84 : f32 to vector<16x1xf32>
    %197 = arith.divf %195, %196 : vector<16x1xf32>
    %198 = vector.broadcast %197 : vector<16x1xf32> to vector<16x32xf32>
    %199 = arith.subf %189, %198 : vector<16x32xf32>
    %200 = arith.mulf %199, %199 : vector<16x32xf32>
    %cst_85 = arith.constant dense<0.000000e+00> : vector<16xf32>
    %201 = vector.multi_reduction <add>, %200, %cst_85 [1] : vector<16x32xf32> to vector<16xf32>
    %202 = vector.shape_cast %201 : vector<16xf32> to vector<16x1xf32>
    %cst_86 = arith.constant 3.200000e+01 : f32
    %203 = vector.broadcast %cst_86 : f32 to vector<16x1xf32>
    %204 = arith.divf %202, %203 : vector<16x1xf32>
    %205 = vector.broadcast %197 : vector<16x1xf32> to vector<16x32xf32>
    %206 = arith.subf %189, %205 : vector<16x32xf32>
    %cst_87 = arith.constant 9.99999974E-6 : f32
    %207 = vector.broadcast %cst_87 : f32 to vector<16x1xf32>
    %208 = arith.addf %204, %207 : vector<16x1xf32>
    %209 = math.rsqrt %208 : vector<16x1xf32>
    %210 = vector.broadcast %209 : vector<16x1xf32> to vector<16x32xf32>
    %211 = arith.mulf %206, %210 : vector<16x32xf32>
    %212 = vector.broadcast %191 : vector<1x32xf32> to vector<16x32xf32>
    %213 = arith.mulf %211, %212 : vector<16x32xf32>
    %214 = vector.broadcast %193 : vector<1x32xf32> to vector<16x32xf32>
    %215 = arith.addf %213, %214 : vector<16x32xf32>
    %216 = arith.truncf %215 : vector<16x32xf32> to vector<16x32xbf16>
    %c1_88 = arith.constant 1 : index
    %c0_89 = arith.constant 0 : index
    %c0_90 = arith.constant 0 : index
    %217 = vector.load %arg6[%c1_88, %c0_89, %c0_90] : memref<2x32x96xbf16, #tpu.memory_space<vmem>>, vector<1x32x96xbf16>
    %218 = vector.shape_cast %217 : vector<1x32x96xbf16> to vector<32x96xbf16>
    %cst_91 = arith.constant dense<0.000000e+00> : vector<16x96xf32>
    %219 = tpu.matmul %216, %218, %cst_91 {dimension_numbers = #tpu.dot_dimension_numbers<[1], [0], [0], [1], [0, 0, 1, 1], [], []>} : vector<16x32xbf16>, vector<32x96xbf16>, vector<16x96xf32> -> vector<16x96xf32>
    %c1_92 = arith.constant 1 : index
    %c0_93 = arith.constant 0 : index
    %c0_94 = arith.constant 0 : index
    %220 = vector.load %arg7[%c1_92, %c0_93, %c0_94] : memref<2x1x96xf32, #tpu.memory_space<vmem>>, vector<1x1x96xf32>
    %221 = vector.shape_cast %220 : vector<1x1x96xf32> to vector<1x96xf32>
    %222 = vector.broadcast %221 : vector<1x96xf32> to vector<16x96xf32>
    %223 = arith.addf %219, %222 : vector<16x96xf32>
    %224 = vector.extract_strided_slice %223 {offsets = [0, 0], sizes = [16, 32], strides = [1, 1]} : vector<16x96xf32> to vector<16x32xf32>
    %225 = arith.truncf %224 : vector<16x32xf32> to vector<16x32xbf16>
    %226 = vector.extract_strided_slice %223 {offsets = [0, 32], sizes = [16, 32], strides = [1, 1]} : vector<16x96xf32> to vector<16x32xf32>
    %227 = tpu.transpose %226, [1, 0] : vector<16x32xf32> -> vector<32x16xf32>
    %228 = arith.truncf %227 : vector<32x16xf32> to vector<32x16xbf16>
    %229 = vector.extract_strided_slice %223 {offsets = [0, 64], sizes = [16, 32], strides = [1, 1]} : vector<16x96xf32> to vector<16x32xf32>
    %230 = arith.truncf %229 : vector<16x32xf32> to vector<16x32xbf16>
    %231 = vector.extract_strided_slice %225 {offsets = [0, 0], sizes = [16, 8], strides = [1, 1]} : vector<16x32xbf16> to vector<16x8xbf16>
    %232 = vector.extract_strided_slice %228 {offsets = [0, 0], sizes = [8, 16], strides = [1, 1]} : vector<32x16xbf16> to vector<8x16xbf16>
    %233 = vector.extract_strided_slice %230 {offsets = [0, 0], sizes = [16, 8], strides = [1, 1]} : vector<16x32xbf16> to vector<16x8xbf16>
    %cst_95 = arith.constant dense<0.000000e+00> : vector<16x16xf32>
    %234 = tpu.matmul %231, %232, %cst_95 {dimension_numbers = #tpu.dot_dimension_numbers<[1], [0], [0], [1], [0, 0, 1, 1], [], []>} : vector<16x8xbf16>, vector<8x16xbf16>, vector<16x16xf32> -> vector<16x16xf32>
    %cst_96 = arith.constant -1.000000e+09 : f32
    %235 = vector.broadcast %cst_96 : f32 to vector<16x16xf32>
    %236 = arith.select %10, %234, %235 : vector<16x16xi1>, vector<16x16xf32>
    %cst_97 = arith.constant dense<0xFF800000> : vector<16xf32>
    %237 = vector.multi_reduction <maximumf>, %236, %cst_97 [1] : vector<16x16xf32> to vector<16xf32>
    %238 = vector.shape_cast %237 : vector<16xf32> to vector<16x1xf32>
    %239 = vector.broadcast %238 : vector<16x1xf32> to vector<16x16xf32>
    %240 = arith.subf %236, %239 : vector<16x16xf32>
    %241 = math.exp %240 : vector<16x16xf32>
    %cst_98 = arith.constant dense<0.000000e+00> : vector<16xf32>
    %242 = vector.multi_reduction <add>, %241, %cst_98 [1] : vector<16x16xf32> to vector<16xf32>
    %243 = vector.shape_cast %242 : vector<16xf32> to vector<16x1xf32>
    %244 = tpu.reciprocal %243 {approx = true} : vector<16x1xf32> -> vector<16x1xf32>
    %245 = vector.broadcast %244 : vector<16x1xf32> to vector<16x16xf32>
    %246 = arith.mulf %241, %245 : vector<16x16xf32>
    %247 = arith.truncf %246 : vector<16x16xf32> to vector<16x16xbf16>
    %cst_99 = arith.constant dense<0.000000e+00> : vector<16x8xf32>
    %248 = tpu.matmul %247, %233, %cst_99 {dimension_numbers = #tpu.dot_dimension_numbers<[1], [0], [0], [1], [0, 0, 1, 1], [], []>} : vector<16x16xbf16>, vector<16x8xbf16>, vector<16x8xf32> -> vector<16x8xf32>
    %249 = vector.extract_strided_slice %225 {offsets = [0, 8], sizes = [16, 8], strides = [1, 1]} : vector<16x32xbf16> to vector<16x8xbf16>
    %250 = vector.extract_strided_slice %228 {offsets = [8, 0], sizes = [8, 16], strides = [1, 1]} : vector<32x16xbf16> to vector<8x16xbf16>
    %251 = vector.extract_strided_slice %230 {offsets = [0, 8], sizes = [16, 8], strides = [1, 1]} : vector<16x32xbf16> to vector<16x8xbf16>
    %cst_100 = arith.constant dense<0.000000e+00> : vector<16x16xf32>
    %252 = tpu.matmul %249, %250, %cst_100 {dimension_numbers = #tpu.dot_dimension_numbers<[1], [0], [0], [1], [0, 0, 1, 1], [], []>} : vector<16x8xbf16>, vector<8x16xbf16>, vector<16x16xf32> -> vector<16x16xf32>
    %cst_101 = arith.constant -1.000000e+09 : f32
    %253 = vector.broadcast %cst_101 : f32 to vector<16x16xf32>
    %254 = arith.select %10, %252, %253 : vector<16x16xi1>, vector<16x16xf32>
    %cst_102 = arith.constant dense<0xFF800000> : vector<16xf32>
    %255 = vector.multi_reduction <maximumf>, %254, %cst_102 [1] : vector<16x16xf32> to vector<16xf32>
    %256 = vector.shape_cast %255 : vector<16xf32> to vector<16x1xf32>
    %257 = vector.broadcast %256 : vector<16x1xf32> to vector<16x16xf32>
    %258 = arith.subf %254, %257 : vector<16x16xf32>
    %259 = math.exp %258 : vector<16x16xf32>
    %cst_103 = arith.constant dense<0.000000e+00> : vector<16xf32>
    %260 = vector.multi_reduction <add>, %259, %cst_103 [1] : vector<16x16xf32> to vector<16xf32>
    %261 = vector.shape_cast %260 : vector<16xf32> to vector<16x1xf32>
    %262 = tpu.reciprocal %261 {approx = true} : vector<16x1xf32> -> vector<16x1xf32>
    %263 = vector.broadcast %262 : vector<16x1xf32> to vector<16x16xf32>
    %264 = arith.mulf %259, %263 : vector<16x16xf32>
    %265 = arith.truncf %264 : vector<16x16xf32> to vector<16x16xbf16>
    %cst_104 = arith.constant dense<0.000000e+00> : vector<16x8xf32>
    %266 = tpu.matmul %265, %251, %cst_104 {dimension_numbers = #tpu.dot_dimension_numbers<[1], [0], [0], [1], [0, 0, 1, 1], [], []>} : vector<16x16xbf16>, vector<16x8xbf16>, vector<16x8xf32> -> vector<16x8xf32>
    %267 = vector.extract_strided_slice %225 {offsets = [0, 16], sizes = [16, 8], strides = [1, 1]} : vector<16x32xbf16> to vector<16x8xbf16>
    %268 = vector.extract_strided_slice %228 {offsets = [16, 0], sizes = [8, 16], strides = [1, 1]} : vector<32x16xbf16> to vector<8x16xbf16>
    %269 = vector.extract_strided_slice %230 {offsets = [0, 16], sizes = [16, 8], strides = [1, 1]} : vector<16x32xbf16> to vector<16x8xbf16>
    %cst_105 = arith.constant dense<0.000000e+00> : vector<16x16xf32>
    %270 = tpu.matmul %267, %268, %cst_105 {dimension_numbers = #tpu.dot_dimension_numbers<[1], [0], [0], [1], [0, 0, 1, 1], [], []>} : vector<16x8xbf16>, vector<8x16xbf16>, vector<16x16xf32> -> vector<16x16xf32>
    %cst_106 = arith.constant -1.000000e+09 : f32
    %271 = vector.broadcast %cst_106 : f32 to vector<16x16xf32>
    %272 = arith.select %10, %270, %271 : vector<16x16xi1>, vector<16x16xf32>
    %cst_107 = arith.constant dense<0xFF800000> : vector<16xf32>
    %273 = vector.multi_reduction <maximumf>, %272, %cst_107 [1] : vector<16x16xf32> to vector<16xf32>
    %274 = vector.shape_cast %273 : vector<16xf32> to vector<16x1xf32>
    %275 = vector.broadcast %274 : vector<16x1xf32> to vector<16x16xf32>
    %276 = arith.subf %272, %275 : vector<16x16xf32>
    %277 = math.exp %276 : vector<16x16xf32>
    %cst_108 = arith.constant dense<0.000000e+00> : vector<16xf32>
    %278 = vector.multi_reduction <add>, %277, %cst_108 [1] : vector<16x16xf32> to vector<16xf32>
    %279 = vector.shape_cast %278 : vector<16xf32> to vector<16x1xf32>
    %280 = tpu.reciprocal %279 {approx = true} : vector<16x1xf32> -> vector<16x1xf32>
    %281 = vector.broadcast %280 : vector<16x1xf32> to vector<16x16xf32>
    %282 = arith.mulf %277, %281 : vector<16x16xf32>
    %283 = arith.truncf %282 : vector<16x16xf32> to vector<16x16xbf16>
    %cst_109 = arith.constant dense<0.000000e+00> : vector<16x8xf32>
    %284 = tpu.matmul %283, %269, %cst_109 {dimension_numbers = #tpu.dot_dimension_numbers<[1], [0], [0], [1], [0, 0, 1, 1], [], []>} : vector<16x16xbf16>, vector<16x8xbf16>, vector<16x8xf32> -> vector<16x8xf32>
    %285 = vector.extract_strided_slice %225 {offsets = [0, 24], sizes = [16, 8], strides = [1, 1]} : vector<16x32xbf16> to vector<16x8xbf16>
    %286 = vector.extract_strided_slice %228 {offsets = [24, 0], sizes = [8, 16], strides = [1, 1]} : vector<32x16xbf16> to vector<8x16xbf16>
    %287 = vector.extract_strided_slice %230 {offsets = [0, 24], sizes = [16, 8], strides = [1, 1]} : vector<16x32xbf16> to vector<16x8xbf16>
    %cst_110 = arith.constant dense<0.000000e+00> : vector<16x16xf32>
    %288 = tpu.matmul %285, %286, %cst_110 {dimension_numbers = #tpu.dot_dimension_numbers<[1], [0], [0], [1], [0, 0, 1, 1], [], []>} : vector<16x8xbf16>, vector<8x16xbf16>, vector<16x16xf32> -> vector<16x16xf32>
    %cst_111 = arith.constant -1.000000e+09 : f32
    %289 = vector.broadcast %cst_111 : f32 to vector<16x16xf32>
    %290 = arith.select %10, %288, %289 : vector<16x16xi1>, vector<16x16xf32>
    %cst_112 = arith.constant dense<0xFF800000> : vector<16xf32>
    %291 = vector.multi_reduction <maximumf>, %290, %cst_112 [1] : vector<16x16xf32> to vector<16xf32>
    %292 = vector.shape_cast %291 : vector<16xf32> to vector<16x1xf32>
    %293 = vector.broadcast %292 : vector<16x1xf32> to vector<16x16xf32>
    %294 = arith.subf %290, %293 : vector<16x16xf32>
    %295 = math.exp %294 : vector<16x16xf32>
    %cst_113 = arith.constant dense<0.000000e+00> : vector<16xf32>
    %296 = vector.multi_reduction <add>, %295, %cst_113 [1] : vector<16x16xf32> to vector<16xf32>
    %297 = vector.shape_cast %296 : vector<16xf32> to vector<16x1xf32>
    %298 = tpu.reciprocal %297 {approx = true} : vector<16x1xf32> -> vector<16x1xf32>
    %299 = vector.broadcast %298 : vector<16x1xf32> to vector<16x16xf32>
    %300 = arith.mulf %295, %299 : vector<16x16xf32>
    %301 = arith.truncf %300 : vector<16x16xf32> to vector<16x16xbf16>
    %cst_114 = arith.constant dense<0.000000e+00> : vector<16x8xf32>
    %302 = tpu.matmul %301, %287, %cst_114 {dimension_numbers = #tpu.dot_dimension_numbers<[1], [0], [0], [1], [0, 0, 1, 1], [], []>} : vector<16x16xbf16>, vector<16x8xbf16>, vector<16x8xf32> -> vector<16x8xf32>
    %303 = tpu.concatenate %248, %266, %284, %302 in 1 : vector<16x8xf32>, vector<16x8xf32>, vector<16x8xf32>, vector<16x8xf32> -> vector<16x32xf32>
    %304 = arith.truncf %303 : vector<16x32xf32> to vector<16x32xbf16>
    %c1_115 = arith.constant 1 : index
    %c0_116 = arith.constant 0 : index
    %c0_117 = arith.constant 0 : index
    %305 = vector.load %arg8[%c1_115, %c0_116, %c0_117] : memref<2x32x32xbf16, #tpu.memory_space<vmem>>, vector<1x32x32xbf16>
    %306 = vector.shape_cast %305 : vector<1x32x32xbf16> to vector<32x32xbf16>
    %cst_118 = arith.constant dense<0.000000e+00> : vector<16x32xf32>
    %307 = tpu.matmul %304, %306, %cst_118 {dimension_numbers = #tpu.dot_dimension_numbers<[1], [0], [0], [1], [0, 0, 1, 1], [], []>} : vector<16x32xbf16>, vector<32x32xbf16>, vector<16x32xf32> -> vector<16x32xf32>
    %308 = arith.addf %189, %307 : vector<16x32xf32>
    %c1_119 = arith.constant 1 : index
    %c0_120 = arith.constant 0 : index
    %c0_121 = arith.constant 0 : index
    %309 = vector.load %arg9[%c1_119, %c0_120, %c0_121] : memref<2x1x32xf32, #tpu.memory_space<vmem>>, vector<1x1x32xf32>
    %310 = vector.shape_cast %309 : vector<1x1x32xf32> to vector<1x32xf32>
    %311 = vector.broadcast %310 : vector<1x32xf32> to vector<16x32xf32>
    %312 = arith.addf %308, %311 : vector<16x32xf32>
    %c1_122 = arith.constant 1 : index
    %c0_123 = arith.constant 0 : index
    %c0_124 = arith.constant 0 : index
    %313 = vector.load %arg10[%c1_122, %c0_123, %c0_124] : memref<2x1x32xf32, #tpu.memory_space<vmem>>, vector<1x1x32xf32>
    %314 = vector.shape_cast %313 : vector<1x1x32xf32> to vector<1x32xf32>
    %c1_125 = arith.constant 1 : index
    %c0_126 = arith.constant 0 : index
    %c0_127 = arith.constant 0 : index
    %315 = vector.load %arg11[%c1_125, %c0_126, %c0_127] : memref<2x1x32xf32, #tpu.memory_space<vmem>>, vector<1x1x32xf32>
    %316 = vector.shape_cast %315 : vector<1x1x32xf32> to vector<1x32xf32>
    %cst_128 = arith.constant dense<0.000000e+00> : vector<16xf32>
    %317 = vector.multi_reduction <add>, %312, %cst_128 [1] : vector<16x32xf32> to vector<16xf32>
    %318 = vector.shape_cast %317 : vector<16xf32> to vector<16x1xf32>
    %cst_129 = arith.constant 3.200000e+01 : f32
    %319 = vector.broadcast %cst_129 : f32 to vector<16x1xf32>
    %320 = arith.divf %318, %319 : vector<16x1xf32>
    %321 = vector.broadcast %320 : vector<16x1xf32> to vector<16x32xf32>
    %322 = arith.subf %312, %321 : vector<16x32xf32>
    %323 = arith.mulf %322, %322 : vector<16x32xf32>
    %cst_130 = arith.constant dense<0.000000e+00> : vector<16xf32>
    %324 = vector.multi_reduction <add>, %323, %cst_130 [1] : vector<16x32xf32> to vector<16xf32>
    %325 = vector.shape_cast %324 : vector<16xf32> to vector<16x1xf32>
    %cst_131 = arith.constant 3.200000e+01 : f32
    %326 = vector.broadcast %cst_131 : f32 to vector<16x1xf32>
    %327 = arith.divf %325, %326 : vector<16x1xf32>
    %328 = vector.broadcast %320 : vector<16x1xf32> to vector<16x32xf32>
    %329 = arith.subf %312, %328 : vector<16x32xf32>
    %cst_132 = arith.constant 9.99999974E-6 : f32
    %330 = vector.broadcast %cst_132 : f32 to vector<16x1xf32>
    %331 = arith.addf %327, %330 : vector<16x1xf32>
    %332 = math.rsqrt %331 : vector<16x1xf32>
    %333 = vector.broadcast %332 : vector<16x1xf32> to vector<16x32xf32>
    %334 = arith.mulf %329, %333 : vector<16x32xf32>
    %335 = vector.broadcast %314 : vector<1x32xf32> to vector<16x32xf32>
    %336 = arith.mulf %334, %335 : vector<16x32xf32>
    %337 = vector.broadcast %316 : vector<1x32xf32> to vector<16x32xf32>
    %338 = arith.addf %336, %337 : vector<16x32xf32>
    %339 = arith.truncf %338 : vector<16x32xf32> to vector<16x32xbf16>
    %c1_133 = arith.constant 1 : index
    %c0_134 = arith.constant 0 : index
    %c0_135 = arith.constant 0 : index
    %340 = vector.load %arg12[%c1_133, %c0_134, %c0_135] : memref<2x32x128xbf16, #tpu.memory_space<vmem>>, vector<1x32x128xbf16>
    %341 = vector.shape_cast %340 : vector<1x32x128xbf16> to vector<32x128xbf16>
    %cst_136 = arith.constant dense<0.000000e+00> : vector<16x128xf32>
    %342 = tpu.matmul %339, %341, %cst_136 {dimension_numbers = #tpu.dot_dimension_numbers<[1], [0], [0], [1], [0, 0, 1, 1], [], []>} : vector<16x32xbf16>, vector<32x128xbf16>, vector<16x128xf32> -> vector<16x128xf32>
    %c1_137 = arith.constant 1 : index
    %c0_138 = arith.constant 0 : index
    %c0_139 = arith.constant 0 : index
    %343 = vector.load %arg13[%c1_137, %c0_138, %c0_139] : memref<2x1x128xf32, #tpu.memory_space<vmem>>, vector<1x1x128xf32>
    %344 = vector.shape_cast %343 : vector<1x1x128xf32> to vector<1x128xf32>
    %345 = vector.broadcast %344 : vector<1x128xf32> to vector<16x128xf32>
    %346 = arith.addf %342, %345 : vector<16x128xf32>
    %cst_140 = arith.constant 5.000000e-01 : f32
    %347 = vector.broadcast %cst_140 : f32 to vector<16x128xf32>
    %348 = arith.mulf %347, %346 : vector<16x128xf32>
    %cst_141 = arith.constant 4.471500e-02 : f32
    %349 = vector.broadcast %cst_141 : f32 to vector<16x128xf32>
    %350 = arith.mulf %349, %346 : vector<16x128xf32>
    %351 = arith.mulf %350, %346 : vector<16x128xf32>
    %352 = arith.mulf %351, %346 : vector<16x128xf32>
    %353 = arith.addf %346, %352 : vector<16x128xf32>
    %cst_142 = arith.constant 0.797884583 : f32
    %354 = vector.broadcast %cst_142 : f32 to vector<16x128xf32>
    %355 = arith.mulf %354, %353 : vector<16x128xf32>
    %356 = math.tanh %355 : vector<16x128xf32>
    %cst_143 = arith.constant 1.000000e+00 : f32
    %357 = vector.broadcast %cst_143 : f32 to vector<16x128xf32>
    %358 = arith.addf %357, %356 : vector<16x128xf32>
    %359 = arith.mulf %348, %358 : vector<16x128xf32>
    %360 = arith.truncf %359 : vector<16x128xf32> to vector<16x128xbf16>
    %c1_144 = arith.constant 1 : index
    %c0_145 = arith.constant 0 : index
    %c0_146 = arith.constant 0 : index
    %361 = vector.load %arg14[%c1_144, %c0_145, %c0_146] : memref<2x128x32xbf16, #tpu.memory_space<vmem>>, vector<1x128x32xbf16>
    %362 = vector.shape_cast %361 : vector<1x128x32xbf16> to vector<128x32xbf16>
    %cst_147 = arith.constant dense<0.000000e+00> : vector<16x32xf32>
    %363 = tpu.matmul %360, %362, %cst_147 {dimension_numbers = #tpu.dot_dimension_numbers<[1], [0], [0], [1], [0, 0, 1, 1], [], []>} : vector<16x128xbf16>, vector<128x32xbf16>, vector<16x32xf32> -> vector<16x32xf32>
    %364 = arith.addf %312, %363 : vector<16x32xf32>
    %c1_148 = arith.constant 1 : index
    %c0_149 = arith.constant 0 : index
    %c0_150 = arith.constant 0 : index
    %365 = vector.load %arg15[%c1_148, %c0_149, %c0_150] : memref<2x1x32xf32, #tpu.memory_space<vmem>>, vector<1x1x32xf32>
    %366 = vector.shape_cast %365 : vector<1x1x32xf32> to vector<1x32xf32>
    %367 = vector.broadcast %366 : vector<1x32xf32> to vector<16x32xf32>
    %368 = arith.addf %364, %367 : vector<16x32xf32>
    %c0_151 = arith.constant 0 : index
    %c0_152 = arith.constant 0 : index
    %369 = vector.load %arg16[%c0_151, %c0_152] : memref<1x32xf32, #tpu.memory_space<vmem>>, vector<1x32xf32>
    %c0_153 = arith.constant 0 : index
    %c0_154 = arith.constant 0 : index
    %370 = vector.load %arg17[%c0_153, %c0_154] : memref<1x32xf32, #tpu.memory_space<vmem>>, vector<1x32xf32>
    %cst_155 = arith.constant dense<0.000000e+00> : vector<16xf32>
    %371 = vector.multi_reduction <add>, %368, %cst_155 [1] : vector<16x32xf32> to vector<16xf32>
    %372 = vector.shape_cast %371 : vector<16xf32> to vector<16x1xf32>
    %cst_156 = arith.constant 3.200000e+01 : f32
    %373 = vector.broadcast %cst_156 : f32 to vector<16x1xf32>
    %374 = arith.divf %372, %373 : vector<16x1xf32>
    %375 = vector.broadcast %374 : vector<16x1xf32> to vector<16x32xf32>
    %376 = arith.subf %368, %375 : vector<16x32xf32>
    %377 = arith.mulf %376, %376 : vector<16x32xf32>
    %cst_157 = arith.constant dense<0.000000e+00> : vector<16xf32>
    %378 = vector.multi_reduction <add>, %377, %cst_157 [1] : vector<16x32xf32> to vector<16xf32>
    %379 = vector.shape_cast %378 : vector<16xf32> to vector<16x1xf32>
    %cst_158 = arith.constant 3.200000e+01 : f32
    %380 = vector.broadcast %cst_158 : f32 to vector<16x1xf32>
    %381 = arith.divf %379, %380 : vector<16x1xf32>
    %382 = vector.broadcast %374 : vector<16x1xf32> to vector<16x32xf32>
    %383 = arith.subf %368, %382 : vector<16x32xf32>
    %cst_159 = arith.constant 9.99999974E-6 : f32
    %384 = vector.broadcast %cst_159 : f32 to vector<16x1xf32>
    %385 = arith.addf %381, %384 : vector<16x1xf32>
    %386 = math.rsqrt %385 : vector<16x1xf32>
    %387 = vector.broadcast %386 : vector<16x1xf32> to vector<16x32xf32>
    %388 = arith.mulf %383, %387 : vector<16x32xf32>
    %389 = vector.broadcast %369 : vector<1x32xf32> to vector<16x32xf32>
    %390 = arith.mulf %388, %389 : vector<16x32xf32>
    %391 = vector.broadcast %370 : vector<1x32xf32> to vector<16x32xf32>
    %392 = arith.addf %390, %391 : vector<16x32xf32>
    %393 = tpu.iota {dimensions = array<i32: 0>} : vector<8x16xi32>
    %394 = tpu.iota {dimensions = array<i32: 1>} : vector<8x16xi32>
    %cst_160 = arith.constant 0.000000e+00 : f32
    %395 = vector.broadcast %cst_160 : f32 to vector<8x16xf32>
    %396 = arith.index_cast %arg0 : i32 to index
    %c0_161 = arith.constant 0 : index
    %397 = memref.load %arg1[%396, %c0_161] : memref<2x8xi32, #tpu.memory_space<smem>>
    %c0_i32_162 = arith.constant 0 : i32
    %c15_i32 = arith.constant 15 : i32
    %398 = arith.maxsi %c0_i32_162, %397 : i32
    %399 = arith.minsi %c15_i32, %398 : i32
    %c0_i32_163 = arith.constant 0 : i32
    %400 = vector.broadcast %c0_i32_163 : i32 to vector<8x16xi32>
    %401 = arith.cmpi eq, %393, %400 : vector<8x16xi32>
    %402 = vector.broadcast %399 : i32 to vector<8x16xi32>
    %403 = arith.cmpi eq, %394, %402 : vector<8x16xi32>
    %404 = arith.andi %401, %403 : vector<8x16xi1>
    %cst_164 = arith.constant 1.000000e+00 : f32
    %405 = vector.broadcast %cst_164 : f32 to vector<8x16xf32>
    %406 = arith.select %404, %405, %395 : vector<8x16xi1>, vector<8x16xf32>
    %407 = arith.index_cast %arg0 : i32 to index
    %c1_165 = arith.constant 1 : index
    %408 = memref.load %arg1[%407, %c1_165] : memref<2x8xi32, #tpu.memory_space<smem>>
    %c0_i32_166 = arith.constant 0 : i32
    %c15_i32_167 = arith.constant 15 : i32
    %409 = arith.maxsi %c0_i32_166, %408 : i32
    %410 = arith.minsi %c15_i32_167, %409 : i32
    %c1_i32 = arith.constant 1 : i32
    %411 = vector.broadcast %c1_i32 : i32 to vector<8x16xi32>
    %412 = arith.cmpi eq, %393, %411 : vector<8x16xi32>
    %413 = vector.broadcast %410 : i32 to vector<8x16xi32>
    %414 = arith.cmpi eq, %394, %413 : vector<8x16xi32>
    %415 = arith.andi %412, %414 : vector<8x16xi1>
    %cst_168 = arith.constant 1.000000e+00 : f32
    %416 = vector.broadcast %cst_168 : f32 to vector<8x16xf32>
    %417 = arith.select %415, %416, %406 : vector<8x16xi1>, vector<8x16xf32>
    %418 = arith.index_cast %arg0 : i32 to index
    %c2 = arith.constant 2 : index
    %419 = memref.load %arg1[%418, %c2] : memref<2x8xi32, #tpu.memory_space<smem>>
    %c0_i32_169 = arith.constant 0 : i32
    %c15_i32_170 = arith.constant 15 : i32
    %420 = arith.maxsi %c0_i32_169, %419 : i32
    %421 = arith.minsi %c15_i32_170, %420 : i32
    %c2_i32 = arith.constant 2 : i32
    %422 = vector.broadcast %c2_i32 : i32 to vector<8x16xi32>
    %423 = arith.cmpi eq, %393, %422 : vector<8x16xi32>
    %424 = vector.broadcast %421 : i32 to vector<8x16xi32>
    %425 = arith.cmpi eq, %394, %424 : vector<8x16xi32>
    %426 = arith.andi %423, %425 : vector<8x16xi1>
    %cst_171 = arith.constant 1.000000e+00 : f32
    %427 = vector.broadcast %cst_171 : f32 to vector<8x16xf32>
    %428 = arith.select %426, %427, %417 : vector<8x16xi1>, vector<8x16xf32>
    %429 = arith.index_cast %arg0 : i32 to index
    %c3 = arith.constant 3 : index
    %430 = memref.load %arg1[%429, %c3] : memref<2x8xi32, #tpu.memory_space<smem>>
    %c0_i32_172 = arith.constant 0 : i32
    %c15_i32_173 = arith.constant 15 : i32
    %431 = arith.maxsi %c0_i32_172, %430 : i32
    %432 = arith.minsi %c15_i32_173, %431 : i32
    %c3_i32 = arith.constant 3 : i32
    %433 = vector.broadcast %c3_i32 : i32 to vector<8x16xi32>
    %434 = arith.cmpi eq, %393, %433 : vector<8x16xi32>
    %435 = vector.broadcast %432 : i32 to vector<8x16xi32>
    %436 = arith.cmpi eq, %394, %435 : vector<8x16xi32>
    %437 = arith.andi %434, %436 : vector<8x16xi1>
    %cst_174 = arith.constant 1.000000e+00 : f32
    %438 = vector.broadcast %cst_174 : f32 to vector<8x16xf32>
    %439 = arith.select %437, %438, %428 : vector<8x16xi1>, vector<8x16xf32>
    %440 = arith.index_cast %arg0 : i32 to index
    %c4 = arith.constant 4 : index
    %441 = memref.load %arg1[%440, %c4] : memref<2x8xi32, #tpu.memory_space<smem>>
    %c0_i32_175 = arith.constant 0 : i32
    %c15_i32_176 = arith.constant 15 : i32
    %442 = arith.maxsi %c0_i32_175, %441 : i32
    %443 = arith.minsi %c15_i32_176, %442 : i32
    %c4_i32 = arith.constant 4 : i32
    %444 = vector.broadcast %c4_i32 : i32 to vector<8x16xi32>
    %445 = arith.cmpi eq, %393, %444 : vector<8x16xi32>
    %446 = vector.broadcast %443 : i32 to vector<8x16xi32>
    %447 = arith.cmpi eq, %394, %446 : vector<8x16xi32>
    %448 = arith.andi %445, %447 : vector<8x16xi1>
    %cst_177 = arith.constant 1.000000e+00 : f32
    %449 = vector.broadcast %cst_177 : f32 to vector<8x16xf32>
    %450 = arith.select %448, %449, %439 : vector<8x16xi1>, vector<8x16xf32>
    %451 = arith.index_cast %arg0 : i32 to index
    %c5 = arith.constant 5 : index
    %452 = memref.load %arg1[%451, %c5] : memref<2x8xi32, #tpu.memory_space<smem>>
    %c0_i32_178 = arith.constant 0 : i32
    %c15_i32_179 = arith.constant 15 : i32
    %453 = arith.maxsi %c0_i32_178, %452 : i32
    %454 = arith.minsi %c15_i32_179, %453 : i32
    %c5_i32 = arith.constant 5 : i32
    %455 = vector.broadcast %c5_i32 : i32 to vector<8x16xi32>
    %456 = arith.cmpi eq, %393, %455 : vector<8x16xi32>
    %457 = vector.broadcast %454 : i32 to vector<8x16xi32>
    %458 = arith.cmpi eq, %394, %457 : vector<8x16xi32>
    %459 = arith.andi %456, %458 : vector<8x16xi1>
    %cst_180 = arith.constant 1.000000e+00 : f32
    %460 = vector.broadcast %cst_180 : f32 to vector<8x16xf32>
    %461 = arith.select %459, %460, %450 : vector<8x16xi1>, vector<8x16xf32>
    %462 = arith.index_cast %arg0 : i32 to index
    %c6 = arith.constant 6 : index
    %463 = memref.load %arg1[%462, %c6] : memref<2x8xi32, #tpu.memory_space<smem>>
    %c0_i32_181 = arith.constant 0 : i32
    %c15_i32_182 = arith.constant 15 : i32
    %464 = arith.maxsi %c0_i32_181, %463 : i32
    %465 = arith.minsi %c15_i32_182, %464 : i32
    %c6_i32 = arith.constant 6 : i32
    %466 = vector.broadcast %c6_i32 : i32 to vector<8x16xi32>
    %467 = arith.cmpi eq, %393, %466 : vector<8x16xi32>
    %468 = vector.broadcast %465 : i32 to vector<8x16xi32>
    %469 = arith.cmpi eq, %394, %468 : vector<8x16xi32>
    %470 = arith.andi %467, %469 : vector<8x16xi1>
    %cst_183 = arith.constant 1.000000e+00 : f32
    %471 = vector.broadcast %cst_183 : f32 to vector<8x16xf32>
    %472 = arith.select %470, %471, %461 : vector<8x16xi1>, vector<8x16xf32>
    %473 = arith.index_cast %arg0 : i32 to index
    %c7 = arith.constant 7 : index
    %474 = memref.load %arg1[%473, %c7] : memref<2x8xi32, #tpu.memory_space<smem>>
    %c0_i32_184 = arith.constant 0 : i32
    %c15_i32_185 = arith.constant 15 : i32
    %475 = arith.maxsi %c0_i32_184, %474 : i32
    %476 = arith.minsi %c15_i32_185, %475 : i32
    %c7_i32 = arith.constant 7 : i32
    %477 = vector.broadcast %c7_i32 : i32 to vector<8x16xi32>
    %478 = arith.cmpi eq, %393, %477 : vector<8x16xi32>
    %479 = vector.broadcast %476 : i32 to vector<8x16xi32>
    %480 = arith.cmpi eq, %394, %479 : vector<8x16xi32>
    %481 = arith.andi %478, %480 : vector<8x16xi1>
    %cst_186 = arith.constant 1.000000e+00 : f32
    %482 = vector.broadcast %cst_186 : f32 to vector<8x16xf32>
    %483 = arith.select %481, %482, %472 : vector<8x16xi1>, vector<8x16xf32>
    %cst_187 = arith.constant dense<0.000000e+00> : vector<8x32xf32>
    %484 = tpu.matmul %483, %392, %cst_187 {dimension_numbers = #tpu.dot_dimension_numbers<[1], [0], [0], [1], [0, 0, 1, 1], [], []>} : vector<8x16xf32>, vector<16x32xf32>, vector<8x32xf32> -> vector<8x32xf32>
    %485 = vector.extract_strided_slice %484 {offsets = [0, 0], sizes = [1, 32], strides = [1, 1]} : vector<8x32xf32> to vector<1x32xf32>
    %486 = vector.extract_strided_slice %484 {offsets = [1, 0], sizes = [1, 32], strides = [1, 1]} : vector<8x32xf32> to vector<1x32xf32>
    %487 = vector.extract_strided_slice %484 {offsets = [2, 0], sizes = [1, 32], strides = [1, 1]} : vector<8x32xf32> to vector<1x32xf32>
    %488 = vector.extract_strided_slice %484 {offsets = [3, 0], sizes = [1, 32], strides = [1, 1]} : vector<8x32xf32> to vector<1x32xf32>
    %489 = vector.extract_strided_slice %484 {offsets = [4, 0], sizes = [1, 32], strides = [1, 1]} : vector<8x32xf32> to vector<1x32xf32>
    %490 = vector.extract_strided_slice %484 {offsets = [5, 0], sizes = [1, 32], strides = [1, 1]} : vector<8x32xf32> to vector<1x32xf32>
    %491 = vector.extract_strided_slice %484 {offsets = [6, 0], sizes = [1, 32], strides = [1, 1]} : vector<8x32xf32> to vector<1x32xf32>
    %492 = vector.extract_strided_slice %484 {offsets = [7, 0], sizes = [1, 32], strides = [1, 1]} : vector<8x32xf32> to vector<1x32xf32>
    %493 = tpu.concatenate %485, %486, %487, %488, %489, %490, %491, %492 in 1 : vector<1x32xf32>, vector<1x32xf32>, vector<1x32xf32>, vector<1x32xf32>, vector<1x32xf32>, vector<1x32xf32>, vector<1x32xf32>, vector<1x32xf32> -> vector<1x256xf32>
    %c0_188 = arith.constant 0 : index
    %c0_189 = arith.constant 0 : index
    %c0_190 = arith.constant 0 : index
    %494 = vector.load %arg18[%c0_188, %c0_189, %c0_190] : memref<1x1x256xf32, #tpu.memory_space<vmem>>, vector<1x1x256xf32>
    %495 = vector.shape_cast %494 : vector<1x1x256xf32> to vector<1x256xf32>
    %496 = vector.shape_cast %493 : vector<1x256xf32> to vector<1x1x256xf32>
    tpu.vector_store %arg18[%c0_188, %c0_189, %c0_190], %496 {strides = array<i32>} : memref<1x1x256xf32, #tpu.memory_space<vmem>>, vector<1x1x256xf32>,
    return
  }
  func.func @transform_0(%arg0: i32, %arg1: memref<2x8xi32, #tpu.memory_space<smem>>) -> (i32, i32, i32) {
    %c0_i32 = arith.constant 0 : i32
    %c0_i32_0 = arith.constant 0 : i32
    %c0_i32_1 = arith.constant 0 : i32
    return %arg0, %c0_i32, %c0_i32_0 : i32, i32, i32
  }
  func.func @transform_1(%arg0: i32, %arg1: memref<2x8xi32, #tpu.memory_space<smem>>) -> (i32, i32, i32) {
    %c0_i32 = arith.constant 0 : i32
    %c0_i32_0 = arith.constant 0 : i32
    %c0_i32_1 = arith.constant 0 : i32
    return %arg0, %c0_i32, %c0_i32_0 : i32, i32, i32
  }
  func.func @transform_2(%arg0: i32, %arg1: memref<2x8xi32, #tpu.memory_space<smem>>) -> (i32, i32, i32) {
    %c0_i32 = arith.constant 0 : i32
    %c0_i32_0 = arith.constant 0 : i32
    %c0_i32_1 = arith.constant 0 : i32
    %c0_i32_2 = arith.constant 0 : i32
    return %c0_i32, %c0_i32_0, %c0_i32_1 : i32, i32, i32
  }
  func.func @transform_3(%arg0: i32, %arg1: memref<2x8xi32, #tpu.memory_space<smem>>) -> (i32, i32, i32) {
    %c0_i32 = arith.constant 0 : i32
    %c0_i32_0 = arith.constant 0 : i32
    %c0_i32_1 = arith.constant 0 : i32
    %c0_i32_2 = arith.constant 0 : i32
    return %c0_i32, %c0_i32_0, %c0_i32_1 : i32, i32, i32
  }
  func.func @transform_4(%arg0: i32, %arg1: memref<2x8xi32, #tpu.memory_space<smem>>) -> (i32, i32, i32) {
    %c0_i32 = arith.constant 0 : i32
    %c0_i32_0 = arith.constant 0 : i32
    %c0_i32_1 = arith.constant 0 : i32
    %c0_i32_2 = arith.constant 0 : i32
    return %c0_i32, %c0_i32_0, %c0_i32_1 : i32, i32, i32
  }
  func.func @transform_5(%arg0: i32, %arg1: memref<2x8xi32, #tpu.memory_space<smem>>) -> (i32, i32, i32) {
    %c0_i32 = arith.constant 0 : i32
    %c0_i32_0 = arith.constant 0 : i32
    %c0_i32_1 = arith.constant 0 : i32
    %c0_i32_2 = arith.constant 0 : i32
    return %c0_i32, %c0_i32_0, %c0_i32_1 : i32, i32, i32
  }
  func.func @transform_6(%arg0: i32, %arg1: memref<2x8xi32, #tpu.memory_space<smem>>) -> (i32, i32, i32) {
    %c0_i32 = arith.constant 0 : i32
    %c0_i32_0 = arith.constant 0 : i32
    %c0_i32_1 = arith.constant 0 : i32
    %c0_i32_2 = arith.constant 0 : i32
    return %c0_i32, %c0_i32_0, %c0_i32_1 : i32, i32, i32
  }
  func.func @transform_7(%arg0: i32, %arg1: memref<2x8xi32, #tpu.memory_space<smem>>) -> (i32, i32, i32) {
    %c0_i32 = arith.constant 0 : i32
    %c0_i32_0 = arith.constant 0 : i32
    %c0_i32_1 = arith.constant 0 : i32
    %c0_i32_2 = arith.constant 0 : i32
    return %c0_i32, %c0_i32_0, %c0_i32_1 : i32, i32, i32
  }
  func.func @transform_8(%arg0: i32, %arg1: memref<2x8xi32, #tpu.memory_space<smem>>) -> (i32, i32, i32) {
    %c0_i32 = arith.constant 0 : i32
    %c0_i32_0 = arith.constant 0 : i32
    %c0_i32_1 = arith.constant 0 : i32
    %c0_i32_2 = arith.constant 0 : i32
    return %c0_i32, %c0_i32_0, %c0_i32_1 : i32, i32, i32
  }
  func.func @transform_9(%arg0: i32, %arg1: memref<2x8xi32, #tpu.memory_space<smem>>) -> (i32, i32, i32) {
    %c0_i32 = arith.constant 0 : i32
    %c0_i32_0 = arith.constant 0 : i32
    %c0_i32_1 = arith.constant 0 : i32
    %c0_i32_2 = arith.constant 0 : i32
    return %c0_i32, %c0_i32_0, %c0_i32_1 : i32, i32, i32
  }
  func.func @transform_10(%arg0: i32, %arg1: memref<2x8xi32, #tpu.memory_space<smem>>) -> (i32, i32, i32) {
    %c0_i32 = arith.constant 0 : i32
    %c0_i32_0 = arith.constant 0 : i32
    %c0_i32_1 = arith.constant 0 : i32
    %c0_i32_2 = arith.constant 0 : i32
    return %c0_i32, %c0_i32_0, %c0_i32_1 : i32, i32, i32
  }
  func.func @transform_11(%arg0: i32, %arg1: memref<2x8xi32, #tpu.memory_space<smem>>) -> (i32, i32, i32) {
    %c0_i32 = arith.constant 0 : i32
    %c0_i32_0 = arith.constant 0 : i32
    %c0_i32_1 = arith.constant 0 : i32
    %c0_i32_2 = arith.constant 0 : i32
    return %c0_i32, %c0_i32_0, %c0_i32_1 : i32, i32, i32
  }
  func.func @transform_12(%arg0: i32, %arg1: memref<2x8xi32, #tpu.memory_space<smem>>) -> (i32, i32, i32) {
    %c0_i32 = arith.constant 0 : i32
    %c0_i32_0 = arith.constant 0 : i32
    %c0_i32_1 = arith.constant 0 : i32
    %c0_i32_2 = arith.constant 0 : i32
    return %c0_i32, %c0_i32_0, %c0_i32_1 : i32, i32, i32
  }
  func.func @transform_13(%arg0: i32, %arg1: memref<2x8xi32, #tpu.memory_space<smem>>) -> (i32, i32, i32) {
    %c0_i32 = arith.constant 0 : i32
    %c0_i32_0 = arith.constant 0 : i32
    %c0_i32_1 = arith.constant 0 : i32
    %c0_i32_2 = arith.constant 0 : i32
    return %c0_i32, %c0_i32_0, %c0_i32_1 : i32, i32, i32
  }
  func.func @transform_14(%arg0: i32, %arg1: memref<2x8xi32, #tpu.memory_space<smem>>) -> (i32, i32) {
    %c0_i32 = arith.constant 0 : i32
    %c0_i32_0 = arith.constant 0 : i32
    %c0_i32_1 = arith.constant 0 : i32
    return %c0_i32, %c0_i32_0 : i32, i32
  }
  func.func @transform_15(%arg0: i32, %arg1: memref<2x8xi32, #tpu.memory_space<smem>>) -> (i32, i32) {
    %c0_i32 = arith.constant 0 : i32
    %c0_i32_0 = arith.constant 0 : i32
    %c0_i32_1 = arith.constant 0 : i32
    return %c0_i32, %c0_i32_0 : i32, i32
  }
  func.func @transform_16(%arg0: i32, %arg1: memref<2x8xi32, #tpu.memory_space<smem>>) -> (i32, i32, i32) {
    %c0_i32 = arith.constant 0 : i32
    %c0_i32_0 = arith.constant 0 : i32
    %c0_i32_1 = arith.constant 0 : i32
    return %arg0, %c0_i32, %c0_i32_0 : i32, i32, i32
  }
}

</mosaic_0001>

<bundles_post_ra>
// kernel: gpt2_encoder_forward.1
= control target key start
LH: loop header
LB: loop body
LE: loop exit
PB: predicated region body
PF: predicated region fallthrough
CT: control target
= control target key end

     0   :  { %s4214_s0 = inlined_call_operand.vmem [shape: s32[2,8], index: 0, kind: input, shape index: {}]   ;;  %s4215_s1 = inlined_call_operand.vmem [shape: f32[2,16,32], index: 1, kind: input, shape index: {}]   ;;  %s4216_s2 = inlined_call_operand.vmem [shape: s32[2,1,16], index: 2, kind: input, shape index: {}]   ;;  %s4217_s3 = inlined_call_operand.vmem [shape: f32[2,1,32], index: 3, kind: input, shape index: {}]   ;;  %s4218_s4 = inlined_call_operand.vmem [shape: f32[2,1,32], index: 4, kind: input, shape index: {}]   ;;  %s4219_s5 = inlined_call_operand.vmem [shape: bf16[2,32,96], index: 5, kind: input, shape index: {}]   ;;  %s4220_s6 = inlined_call_operand.vmem [shape: f32[2,1,96], index: 6, kind: input, shape index: {}]   ;;  %s4221_s7 = inlined_call_operand.vmem [shape: bf16[2,32,32], index: 7, kind: input, shape index: {}]   ;;  %s4222_s8 = inlined_call_operand.vmem [shape: f32[2,1,32], index: 8, kind: input, shape index: {}]   ;;  %s4223_s9 = inlined_call_operand.vmem [shape: f32[2,1,32], index: 9, kind: input, shape index: {}]   ;;  %s4224_s10 = inlined_call_operand.vmem [shape: f32[2,1,32], index: 10, kind: input, shape index: {}]   ;;  %s4225_s11 = inlined_call_operand.vmem [shape: bf16[2,32,128], index: 11, kind: input, shape index: {}]   ;;  %s4226_s12 = inlined_call_operand.vmem [shape: f32[2,1,128], index: 12, kind: input, shape index: {}]   ;;  %s4227_s13 = inlined_call_operand.vmem [shape: bf16[2,128,32], index: 13, kind: input, shape index: {}]   ;;  %s4228_s14 = inlined_call_operand.vmem [shape: f32[2,1,32], index: 14, kind: input, shape index: {}]   ;;  %s4229_s15 = inlined_call_operand.vmem [shape: f32[1,32], index: 15, kind: input, shape index: {}]   ;;  %s4230_s16 = inlined_call_operand.vmem [shape: f32[1,32], index: 16, kind: input, shape index: {}]   ;;  %s4231_s17 = inlined_call_operand.vmem [shape: f32[2,1,256], index: 17, kind: output, shape index: {}]  }
   0x1   :  { %4244 = sst [smem:[#allocation5_spill]] %s4214_s0 }
   0x2   :  { %4245 = sst [smem:[#allocation6_spill]] %s4215_s1 }
   0x3   :  { %4246 = sst [smem:[#allocation7_spill]] %s4224_s10 }
   0x4   :  { %s4247_s26 = sld [smem:[#allocation5_spill]] }
   0xa   :  { %s22_s10 = sshll.u32 %s4247_s26, 4  ;;  %s23_s10 = int_to_ptr.vmem [resolvable:$true] %s22_s10 }
   0xb   :  { %s3496_s27 = scalar_lea.vmem %s23_s10, 32  ;;  %p3501_p1 = scmp.lt.s32.totalorder %s23_s10, %s23_s10 }
   0xc   :  { %p3497_p0 = scmp.ne.s32.totalorder %s23_s10, %s3496_s27  ;;  %p3502_p2 = scmp.lt.s32.totalorder %s3496_s27, %s3496_s27 }
   0xe   :  { %p3503_p3 = por %p3502_p2, %p3501_p1 }
  0x10   :  { %p3504_p4 = pnand %p3503_p3, %p3497_p0 }
  0x12   :  { %3507 = shalt.err (!%p3504_p4)  }
  0x13   :  { %s3518_s28 = smov [#allocation3]  }
  0x14   :  { %25 = dma.vmem_to_smem %s23_s10, 32, %s3518_s28, [#allocation2] }
  0x15   :  { %3512 = dma.done.wait [#allocation2], 32 }
  0x16   :  { %3513 = vsyncadd [#allocation2], 4294967264 }
  0x17   :  { %27 = sfence }
  0x18   :  { %s3628_s29 = smov 0  }
  0x19 LB: > { %s3634_s0 = sadd.s32 4294967295, %s3516_s29   ;;  %p2890_p5 = scmp.ge.s32.totalorder %s3516_s29, 1  ;;  %s3516_s29 = sphi %s3628_s29, %s33_s29  }
  0x1a   : > { %p477_p6 = scmp.lt.s32.totalorder %s3516_s29, 3 }
  0x1c   : > { %p478_p7 = pnand %p2890_p5, %p477_p6 }
  0x1d   : > { %p529_p8 = scmp.lt.s32.totalorder (!%p478_p7), %s3634_s0, 1  ;;  %s4248_s1 = sld [smem:[#allocation6_spill]] (!%p478_p7) }
  0x1e   : > { %481 = sbr.rel (%p478_p7) target bundleno = 6346 (0x18ca), region = 84  ;;  %s4240_s19 = smov (!%p478_p7), 96  }
  0x1f   : > { %s4239_s21 = smov (!%p478_p7), 104   ;;  %s4242_s25 = smov (!%p478_p7), 64  }
  0x20   : > { %s4238_s26 = smov (!%p478_p7), 48   ;;  %s4236_s27 = smov (!%p478_p7), 40  }
  0x21   : > { %s4237_s28 = smov (!%p478_p7), 56   ;;  %s4235_s22 = smov (!%p478_p7), 8  }
  0x22   : > { %s4233_s18 = smov (!%p478_p7), 24   ;;  %s4258_s23 = smov (!%p478_p7), 8  }
  0x23   : > { %s3640_s10 = scalar_select %p529_p8, %s3634_s0, 1  ;;  %vm563_vm0 = vcmask 261120   ;;  %v3376_v14 = vld [vmem:[%s4219_s5 + $0x8] sm:$0xff]   ;;  %v3519_v15 = vmov 0.0   ;;  %vm3520_vm1 = vmmov 0   ;;  %v3377_v16 = vld [vmem:[%s4219_s5] sm:$0xff]   ;;  %v546_v59 = vlaneseq }
  0x24   : > { %3130 = vmatprep.subr.bf16.mxu0 %v3519_v15  ;;  %3134 = vmatprep.mubr.msk.bf16.mxu0 %vm3520_vm1, %v3519_v15  ;;  %v2894_v25 = vld [vmem:[%s4217_s3] ss:$0 sm:$0xff]  ;;  %vm722_vm2 = vcmask 1043456   ;;  %vm718_vm3 = vcmask 64512   ;;  %v3525_v63 = vmov 0   ;;  %vm769_vm9 = vcmask 130048  }
  0x25   : > { %s3042_s30 = sshll.u32 %s3640_s10, 4  ;;  %3131 = vmatpush3.bf16.msra.mxu0 %v3376_v14  ;;  %3144 = vmatprep.subr.bf16.mxu1 %v3519_v15  ;;  %v2895_v29 = vld [vmem:[%s4218_s4] ss:$0 sm:$0xff]  ;;  %s536_s24 = scalar_lea.vmem %s4216_s2, %s3640_s10  ;;  %v3720_v61 = vshrl.u32 %v546_v59, 7  ;;  %vm1236_vm11 = vcmask 195584  }
  0x26   : > { %s533_s20 = scalar_lea.vmem %s4248_s1, %s3042_s30  ;;  %3132 = vmatprep.subr.bf16.mxu0 %v3519_v15  ;;  %3146 = vmatprep.mubr.msk.bf16.mxu1 %vm3520_vm1, %v3519_v15  ;;  %v2896_v34 = vld [vmem:[%s4220_s6] ss:$0 sm:$0xff]  ;;  %s3522_s1 = smov 120  }
  0x27   : > { %v3646_v0 = vld [vmem:[%s533_s20] sm:$0xff]  ;;  %v3648_v1 = vld [vmem:[%s533_s20 + $0x8] sm:$0xff]  ;;  %s3523_s20 = smov 112   ;;  %v556_v62 = vsub.s32 0, %v3720_v61  ;;  %s4234_s30 = smov 16   ;;  %vm2611_vm12 = vcmp.eq.s32.totalorder %v3720_v61, 0 }
  0x28   : > { %v564_v2 = vsel %vm563_vm0, %v3646_v0, 0.0  ;;  %v567_v3 = vsel %vm563_vm0, %v3648_v1, 0.0  ;;  %v544_v60 = vld [vmem:[%s536_s24] sm:$0x1]  ;;  %s4259_s24 = smov 16   ;;  %vm2622_vm14 = vcmp.eq.s32.totalorder %v3720_v61, 1 }
  0x29   : > { %565 = vadd.xlane.f32.xlu0 %v564_v2  ;;  %3133 = vmatpush3.bf16.msra.mxu0 %v3377_v16  ;;  %vm545_vm4 = vcmp.gt.s32.totalorder %v544_v60, 0 }
  0x2a   : > { %3138 = vmatprep.subr.bf16.mxu0 %v3519_v15  ;;  %v553_v2 = vsel %vm545_vm4, 1, %v3525_v63 }
  0x2d   : > { %568 = vadd.xlane.f32.xlu0 %v567_v3  ;;  %v3724_v3 = vand.u32 127, %v546_v59 }
  0x2f   : > { %vm551_vm5 = vcmp.le.s32.totalorder %v3724_v3, %v3720_v61 }
  0xb2   : > { %v566_v4 = vpop.xlane.xlu0 %565 }
  0xb3   : > { %v571_v5 = vmul.f32 0.03125, %v566_v4  ;;  %v557_v4 = vrot.slane %v553_v2, %v556_v62 }
  0xb5   : > { %v573_v6 = vsub.f32 %v3646_v0, %v571_v5  ;;  %v548_v5 = vadd.s32 8, %v3720_v61  ;;  %vm558_vm6 = vcmp.eq.s32.totalorder %v557_v4, 1 }
  0xb6   : > { %v569_v7 = vpop.xlane.xlu0 %568  ;;  %vm3729_vm7 = vmand %vm551_vm5, %vm558_vm6 }
  0xb7   : > { %v572_v8 = vmul.f32 0.03125, %v569_v7  ;;  %v575_v9 = vmul.f32 %v573_v6, %v573_v6  ;;  %vm552_vm8 = vcmp.le.s32.totalorder %v3724_v3, %v548_v5 }
  0xb8   : > { %vm3736_vm10 = vmand %vm552_vm8, %vm558_vm6  ;;  %vm2644_vm6 = vcmp.eq.s32.totalorder %v3720_v61, 3 }
  0xb9   : > { %v574_v10 = vsub.f32 %v3648_v1, %v572_v8  ;;  %v577_v11 = vsel %vm563_vm0, %v575_v9, 0.0 }
  0xba   : > { %578 = vadd.xlane.f32.xlu1 %v577_v11 }
  0xbb   : > { %v576_v12 = vmul.f32 %v574_v10, %v574_v10 }
  0xbd   : > { %v580_v13 = vsel %vm563_vm0, %v576_v12, 0.0 }
  0xbe   : > { %581 = vadd.xlane.f32.xlu1 %v580_v13 }
 0x143   : > { %v579_v17 = vpop.xlane.xlu1 %578 }
 0x144   : > { %v583_v18 = vmul.f32 0.03125, %v579_v17 }
 0x146   : > { %v585_v19 = vadd.f32 1e-05, %v583_v18 }
 0x147   : > { %v582_v20 = vpop.xlane.xlu1 %581 }
 0x148   : > { %3404 = vrsqrt.f32 %v585_v19  ;;  %v584_v21 = vmul.f32 0.03125, %v582_v20 }
 0x14a   : > { %v586_v22 = vadd.f32 1e-05, %v584_v21 }
 0x14c   : > { %3406 = vrsqrt.f32 %v586_v22 }
 0x155   : > { %v3405_v23 = vpop.eup %3404 }
 0x156   : > { %v589_v24 = vmul.f32 %v3405_v23, %v573_v6 }
 0x158   : > { %v597_v28 = vmul.f32 %v2894_v25, %v589_v24 }
 0x159   : > { %v3407_v26 = vpop.eup %3406 }
 0x15a   : > { %v590_v27 = vmul.f32 %v3407_v26, %v574_v10  ;;  %v605_v31 = vadd.f32 %v2895_v29, %v597_v28 }
 0x15c   : > { %v598_v30 = vmul.f32 %v2894_v25, %v590_v27 }
 0x15e   : > { %v606_v32 = vadd.f32 %v2895_v29, %v598_v30 }
 0x160   : > { %v607_v33 = vpack.c.bf16 %v606_v32, %v605_v31 }
 0x162   : > { %3135 = vmatmul.mubr.msk.bf16.vlgmr.msra.gmra.mxu0 %vm563_vm0, %v607_v33 }
 0x163   : > { %3140 = vmatprep.mubr.msk.bf16.mxu0 %vm3520_vm1, %v3519_v15 }
 0x222   : > { %v668_v35 = vpop.f32.mrf.mxu0 }
 0x223   : > { %v669_v36 = vadd.f32 %v2896_v34, %v668_v35 }
 0x224   : > { %v3136_v37 = vpop.f32.mrf.mxu0 }
 0x225   : > { %678 = vrot.lane.b32.xlu0 %v669_v36, %s4240_s19 }
 0x226   : > { %v671_v38 = vpop.f32.mrf.mxu0 }
 0x227   : > { %v672_v39 = vadd.f32 %v2896_v34, %v671_v38 }
 0x228   : > { %v3137_v40 = vpop.f32.mrf.mxu0 }
 0x229   : > { %680 = vrot.lane.b32.xlu1 %v672_v39, %s4240_s19  ;;  %v3686_v41 = vpack.c.bf16 %v672_v39, %v669_v36 }
 0x22d   : > { %841 = vrot.lane.b32.xlu1 %v3686_v41, %s3522_s1 }
 0x231   : > { %964 = vrot.lane.b32.xlu1 %v3686_v41, %s3523_s20 }
 0x235   : > { %1085 = vrot.lane.b32.xlu1 %v3686_v41, %s4239_s21  ;;  %s4257_s21 = smov 40  }
 0x297   : > { %v679_v42 = vpop.permute.xlu0 %678 }
 0x298   : > { %684 = vxpose.xlu0.b32.start [1/2] (short) (narrow) %v679_v42, 32 }
 0x29b   : > { %v681_v43 = vpop.permute.xlu1 %680 }
 0x29c   : > { %685 = vxpose.xlu0.b32.end [2/2] (short) (narrow) %v681_v43, 32 }
 0x29f   : > { %v842_v54 = vpop.permute.xlu1 %841 }
 0x2a3   : > { %v965_v56 = vpop.permute.xlu1 %964 }
 0x2a7   : > { %v1086_v58 = vpop.permute.xlu1 %1085 }
 0x314   : > { %v700_v44 = vpop.trf.xlu0 }
 0x318   : > { %v701_v45 = vpop.trf.xlu0 }
 0x319   : > { %v716_v46 = vpack.c.bf16 %v701_v45, %v700_v44 }
 0x31b   : > { %v724_v47 = vsel %vm722_vm2, %v716_v46, 0  ;;  %v844_v48 = vrot.slane %v716_v46, 4 }
 0x31c   : > { %3139 = vmatpush3.bf16.msra.mxu0 %v724_v47  ;;  %v702_v49 = vpop.trf.xlu0 }
 0x31d   : > { %3150 = vmatprep.subr.bf16.mxu0 %v3519_v15  ;;  %v849_v50 = vsel %vm722_vm2, %v844_v48, 0 }
 0x31f   : > { %3141 = vmatmul.mubr.msk.bf16.vlgmr.msra.gmra.mxu0 %vm718_vm3, %v3686_v41 }
 0x320   : > { %3151 = vmatpush3.bf16.msra.mxu0 %v849_v50  ;;  %v703_v51 = vpop.trf.xlu0  ;;  %3152 = vmatprep.mubr.msk.bf16.mxu0 %vm3520_vm1, %v3519_v15 }
 0x321   : > { %v717_v52 = vpack.c.bf16 %v703_v51, %v702_v49  ;;  %3162 = vmatprep.subr.bf16.mxu0 %v3519_v15 }
 0x323   : > { %v970_v53 = vsel %vm722_vm2, %v717_v52, 0  ;;  %v1088_v55 = vrot.slane %v717_v52, 4 }
 0x325   : > { %v1093_v57 = vsel %vm722_vm2, %v1088_v55, 0 }
 0x327   : > { %3153 = vmatmul.mubr.msk.bf16.vlgmr.msra.gmra.mxu0 %vm718_vm3, %v842_v54 }
 0x328   : > { %3163 = vmatpush3.bf16.msra.mxu0 %v970_v53  ;;  %3164 = vmatprep.mubr.msk.bf16.mxu0 %vm3520_vm1, %v3519_v15 }
 0x329   : > { %3174 = vmatprep.subr.bf16.mxu0 %v3519_v15 }
 0x32f   : > { %3165 = vmatmul.mubr.msk.bf16.vlgmr.msra.gmra.mxu0 %vm718_vm3, %v965_v56 }
 0x330   : > { %3175 = vmatpush3.bf16.msra.mxu0 %v1093_v57  ;;  %3176 = vmatprep.mubr.msk.bf16.mxu0 %vm3520_vm1, %v3519_v15 }
 0x331   : > { %3186 = vmatprep.subr.bf16.mxu0 %v3519_v15 }
 0x337   : > { %3177 = vmatmul.mubr.msk.bf16.vlgmr.msra.gmra.mxu0 %vm718_vm3, %v1086_v58 }
 0x338   : > { %3190 = vmatprep.mubr.msk.bf16.mxu0 %vm3520_vm1, %v3519_v15 }
 0x3df   : > { %v760_v7 = vpop.f32.mrf.mxu0 }
 0x3e0   : > { %v767_v8 = vsel %vm3729_vm7, %v760_v7, -1e+09 }
 0x3e1   : > { %v3142_v10 = vpop.f32.mrf.mxu0  ;;  %v770_v11 = vsel %vm769_vm9, %v767_v8, -inf }
 0x3e2   : > { %771 = vmax.xlane.f32.xlu1 %v770_v11 }
 0x3e3   : > { %v763_v12 = vpop.f32.mrf.mxu0 }
 0x3e4   : > { %v768_v13 = vsel %vm3736_vm10, %v763_v12, -1e+09 }
 0x3e5   : > { %v3143_v14 = vpop.f32.mrf.mxu0  ;;  %v773_v16 = vsel %vm769_vm9, %v768_v13, -inf }
 0x3e6   : > { %774 = vmax.xlane.f32.xlu0 %v773_v16 }
 0x3e7   : > { %v885_v17 = vpop.f32.mrf.mxu0 }
 0x3e8   : > { %v892_v18 = vsel %vm3729_vm7, %v885_v17, -1e+09 }
 0x3e9   : > { %v3154_v19 = vpop.f32.mrf.mxu0  ;;  %v894_v20 = vsel %vm769_vm9, %v892_v18, -inf }
 0x3ea   : > { %895 = vmax.xlane.f32.xlu1 %v894_v20 }
 0x3eb   : > { %v888_v21 = vpop.f32.mrf.mxu0 }
 0x3ec   : > { %v893_v22 = vsel %vm3736_vm10, %v888_v21, -1e+09 }
 0x3ed   : > { %v3155_v23 = vpop.f32.mrf.mxu0  ;;  %v897_v24 = vsel %vm769_vm9, %v893_v22, -inf }
 0x3ee   : > { %898 = vmax.xlane.f32.xlu1 %v897_v24 }
 0x3ef   : > { %v1006_v25 = vpop.f32.mrf.mxu0 }
 0x3f0   : > { %v1013_v26 = vsel %vm3729_vm7, %v1006_v25, -1e+09 }
 0x3f1   : > { %v3166_v27 = vpop.f32.mrf.mxu0  ;;  %v1015_v28 = vsel %vm769_vm9, %v1013_v26, -inf }
 0x3f2   : > { %1016 = vmax.xlane.f32.xlu1 %v1015_v28 }
 0x3f3   : > { %v1009_v29 = vpop.f32.mrf.mxu0 }
 0x3f4   : > { %v1014_v30 = vsel %vm3736_vm10, %v1009_v29, -1e+09 }
 0x3f5   : > { %v3167_v31 = vpop.f32.mrf.mxu0  ;;  %v1018_v32 = vsel %vm769_vm9, %v1014_v30, -inf }
 0x3f6   : > { %1019 = vmax.xlane.f32.xlu1 %v1018_v32 }
 0x3f7   : > { %v1129_v33 = vpop.f32.mrf.mxu0 }
 0x3f8   : > { %v1136_v34 = vsel %vm3729_vm7, %v1129_v33, -1e+09 }
 0x3f9   : > { %v3178_v35 = vpop.f32.mrf.mxu0  ;;  %v1138_v36 = vsel %vm769_vm9, %v1136_v34, -inf }
 0x3fa   : > { %1139 = vmax.xlane.f32.xlu1 %v1138_v36 }
 0x3fb   : > { %v1132_v37 = vpop.f32.mrf.mxu0 }
 0x3fc   : > { %v1137_v38 = vsel %vm3736_vm10, %v1132_v37, -1e+09 }
 0x3fd   : > { %v3179_v39 = vpop.f32.mrf.mxu0  ;;  %v1141_v40 = vsel %vm769_vm9, %v1137_v38, -inf }
 0x3fe   : > { %1142 = vmax.xlane.f32.xlu1 %v1141_v40 }
 0x40f   : > { %794 = vrot.lane.b32.xlu1 %v3686_v41, %s4242_s25 }
 0x46b   : > { %v772_v42 = vpop.xlane.xlu1 %771 }
 0x46c   : > { %v776_v43 = vsub.f32 %v767_v8, %v772_v42 }
 0x46e   : > { %v778_v44 = vmul.f32 1.442695, %v776_v43 }
 0x46f   : > { %v775_v45 = vpop.xlane.xlu0 %774 }
 0x470   : > { %3408 = vpow2.f32 %v778_v44  ;;  %v777_v46 = vsub.f32 %v768_v13, %v775_v45 }
 0x472   : > { %v780_v47 = vmul.f32 1.442695, %v777_v46 }
 0x473   : > { %v896_v48 = vpop.xlane.xlu1 %895 }
 0x474   : > { %3410 = vpow2.f32 %v780_v47  ;;  %v900_v49 = vsub.f32 %v892_v18, %v896_v48 }
 0x476   : > { %v902_v50 = vmul.f32 1.442695, %v900_v49 }
 0x477   : > { %v899_v51 = vpop.xlane.xlu1 %898 }
 0x478   : > { %3412 = vpow2.f32 %v902_v50  ;;  %v901_v52 = vsub.f32 %v893_v22, %v899_v51 }
 0x47a   : > { %v904_v53 = vmul.f32 1.442695, %v901_v52 }
 0x47b   : > { %v1017_v54 = vpop.xlane.xlu1 %1016 }
 0x47c   : > { %3414 = vpow2.f32 %v904_v53  ;;  %v1021_v55 = vsub.f32 %v1013_v26, %v1017_v54 }
 0x47d   : > { %v3409_v56 = vpop.eup %3408 }
 0x47e   : > { %v1023_v57 = vmul.f32 1.442695, %v1021_v55  ;;  %v782_v58 = vsel %vm769_vm9, %v3409_v56, 0.0 }
 0x47f   : > { %v1020_v60 = vpop.xlane.xlu1 %1019  ;;  %783 = vadd.xlane.f32.xlu1 %v782_v58 }
 0x480   : > { %3416 = vpow2.f32 %v1023_v57  ;;  %v1022_v62 = vsub.f32 %v1014_v30, %v1020_v60 }
 0x481   : > { %v3411_v63 = vpop.eup %3410 }
 0x482   : > { %v1025_v2 = vmul.f32 1.442695, %v1022_v62  ;;  %v785_v4 = vsel %vm769_vm9, %v3411_v63, 0.0 }
 0x483   : > { %v1140_v5 = vpop.xlane.xlu1 %1139  ;;  %786 = vadd.xlane.f32.xlu1 %v785_v4 }
 0x484   : > { %3418 = vpow2.f32 %v1025_v2  ;;  %v1144_v7 = vsub.f32 %v1136_v34, %v1140_v5 }
 0x485   : > { %v3413_v8 = vpop.eup %3412 }
 0x486   : > { %v1146_v10 = vmul.f32 1.442695, %v1144_v7  ;;  %v906_v11 = vsel %vm769_vm9, %v3413_v8, 0.0  ;;  %v3378_v7 = vld [vmem:[%s4221_s7 + $0x8] sm:$0xff]  }
 0x487   : > { %907 = vadd.xlane.f32.xlu1 %v906_v11  ;;  %v1143_v12 = vpop.xlane.xlu1 %1142  ;;  %3187 = vmatpush3.bf16.msra.mxu0 %v3378_v7 }
 0x488   : > { %3420 = vpow2.f32 %v1146_v10  ;;  %v1145_v13 = vsub.f32 %v1137_v38, %v1143_v12  ;;  %3188 = vmatprep.subr.bf16.mxu0 %v3519_v15 }
 0x489   : > { %v3415_v14 = vpop.eup %3414 }
 0x48a   : > { %v1148_v16 = vmul.f32 1.442695, %v1145_v13  ;;  %v909_v17 = vsel %vm769_vm9, %v3415_v14, 0.0  ;;  %v3379_v13 = vld [vmem:[%s4221_s7] sm:$0xff]  }
 0x48b   : > { %910 = vadd.xlane.f32.xlu1 %v909_v17  ;;  %v795_v18 = vpop.permute.xlu1 %794  ;;  %3189 = vmatpush3.bf16.msra.mxu0 %v3379_v13 }
 0x48c   : > { %3422 = vpow2.f32 %v1148_v16  ;;  %3145 = vmatpush3.bf16.msra.mxu1 %v795_v18  ;;  %3202 = vmatprep.subr.bf16.mxu0 %v3519_v15 }
 0x48d   : > { %v3417_v19 = vpop.eup %3416  ;;  %3156 = vmatprep.subr.bf16.mxu1 %v3519_v15 }
 0x48e   : > { %v1027_v20 = vsel %vm769_vm9, %v3417_v19, 0.0 }
 0x48f   : > { %1028 = vadd.xlane.f32.xlu1 %v1027_v20 }
 0x491   : > { %v3419_v21 = vpop.eup %3418 }
 0x492   : > { %v1030_v22 = vsel %vm769_vm9, %v3419_v21, 0.0 }
 0x493   : > { %1031 = vadd.xlane.f32.xlu0 %v1030_v22 }
 0x495   : > { %v3421_v23 = vpop.eup %3420 }
 0x496   : > { %v1150_v24 = vsel %vm769_vm9, %v3421_v23, 0.0 }
 0x497   : > { %1151 = vadd.xlane.f32.xlu1 %v1150_v24 }
 0x499   : > { %v3423_v25 = vpop.eup %3422 }
 0x49a   : > { %v1153_v26 = vsel %vm769_vm9, %v3423_v25, 0.0 }
 0x49b   : > { %1154 = vadd.xlane.f32.xlu0 %v1153_v26 }
 0x4a8   : > { %1038 = vrot.lane.b32.xlu1 %v3686_v41, %s4238_s26  ;;  %s4254_s26 = smov 104  }
 0x4ac   : > { %1161 = vrot.lane.b32.xlu1 %v3686_v41, %s4236_s27 }
 0x4b1   : > { %917 = vrot.lane.b32.xlu0 %v3686_v41, %s4237_s28 }
 0x508   : > { %v784_v27 = vpop.xlane.xlu1 %783 }
 0x509   : > { %3424 = vrcp.f32 %v784_v27 }
 0x50c   : > { %v787_v28 = vpop.xlane.xlu1 %786 }
 0x50d   : > { %3426 = vrcp.f32 %v787_v28 }
 0x510   : > { %v908_v29 = vpop.xlane.xlu1 %907 }
 0x514   : > { %v911_v30 = vpop.xlane.xlu1 %910 }
 0x515   : > { %3428 = vrcp.f32 %v911_v30 }
 0x516   : > { %v3425_v31 = vpop.eup %3424  ;;  %3430 = vrcp.f32 %v908_v29 }
 0x517   : > { %v790_v33 = vmul.f32 %v3425_v31, %v3409_v56 }
 0x518   : > { %v1029_v36 = vpop.xlane.xlu1 %1028 }
 0x51a   : > { %v3427_v32 = vpop.eup %3426 }
 0x51b   : > { %v791_v34 = vmul.f32 %v3427_v32, %v3411_v63 }
 0x51c   : > { %v1032_v35 = vpop.xlane.xlu0 %1031 }
 0x51d   : > { %v792_v37 = vpack.c.bf16 %v791_v34, %v790_v33  ;;  %3432 = vrcp.f32 %v1032_v35 }
 0x51e   : > { %3434 = vrcp.f32 %v1029_v36 }
 0x51f   : > { %3147 = vmatmul.mubr.msk.bf16.vlgmr.msra.gmra.mxu1 %vm769_vm9, %v792_v37 }
 0x520   : > { %3158 = vmatprep.mubr.msk.bf16.mxu1 %vm3520_vm1, %v3519_v15  ;;  %v1152_v40 = vpop.xlane.xlu1 %1151 }
 0x522   : > { %v3429_v41 = vpop.eup %3428 }
 0x523   : > { %v3431_v39 = vpop.eup %3430  ;;  %v915_v42 = vmul.f32 %v3429_v41, %v3415_v14 }
 0x524   : > { %v1155_v38 = vpop.xlane.xlu0 %1154  ;;  %v914_v44 = vmul.f32 %v3431_v39, %v3413_v8  ;;  %v1039_v47 = vpop.permute.xlu1 %1038  ;;  %v2911_v39 = vld [vmem:[%s4222_s8] ss:$0 sm:$0xff] }
 0x525   : > { %3436 = vrcp.f32 %v1155_v38 }
 0x526   : > { %3438 = vrcp.f32 %v1152_v40  ;;  %v916_v45 = vpack.c.bf16 %v915_v42, %v914_v44 }
 0x528   : > { %v918_v43 = vpop.permute.xlu0 %917  ;;  %v1162_v53 = vpop.permute.xlu1 %1161 }
 0x529   : > { %3157 = vmatpush3.bf16.msra.mxu1 %v918_v43 }
 0x52a   : > { %3168 = vmatprep.subr.bf16.mxu1 %v3519_v15  ;;  %v3433_v46 = vpop.eup %3432 }
 0x52b   : > { %v3435_v48 = vpop.eup %3434  ;;  %v1036_v49 = vmul.f32 %v3433_v46, %v3419_v21 }
 0x52c   : > { %3159 = vmatmul.mubr.msk.bf16.vlgmr.msra.gmra.mxu1 %vm769_vm9, %v916_v45  ;;  %v1035_v50 = vmul.f32 %v3435_v48, %v3417_v19 }
 0x52d   : > { %3169 = vmatpush3.bf16.msra.mxu1 %v1039_v47  ;;  %3170 = vmatprep.mubr.msk.bf16.mxu1 %vm3520_vm1, %v3519_v15 }
 0x52e   : > { %3180 = vmatprep.subr.bf16.mxu1 %v3519_v15  ;;  %v1037_v51 = vpack.c.bf16 %v1036_v49, %v1035_v50 }
 0x532   : > { %v3437_v52 = vpop.eup %3436 }
 0x533   : > { %v3439_v54 = vpop.eup %3438  ;;  %v1159_v55 = vmul.f32 %v3437_v52, %v3423_v25 }
 0x534   : > { %3171 = vmatmul.mubr.msk.bf16.vlgmr.msra.gmra.mxu1 %vm769_vm9, %v1037_v51  ;;  %v1158_v56 = vmul.f32 %v3439_v54, %v3421_v23 }
 0x535   : > { %3181 = vmatpush3.bf16.msra.mxu1 %v1162_v53  ;;  %3182 = vmatprep.mubr.msk.bf16.mxu1 %vm3520_vm1, %v3519_v15 }
 0x536   : > { %3194 = vmatprep.subr.bf16.mxu1 %v3519_v15  ;;  %v1160_v57 = vpack.c.bf16 %v1159_v55, %v1158_v56 }
 0x53c   : > { %3183 = vmatmul.mubr.msk.bf16.vlgmr.msra.gmra.mxu1 %vm769_vm9, %v1160_v57 }
 0x53d   : > { %3198 = vmatprep.mubr.msk.bf16.mxu1 %vm3520_vm1, %v3519_v15 }
 0x5df   : > { %v834_v58 = vpop.f32.mrf.mxu1 }
 0x5e1   : > { %v3148_v60 = vpop.f32.mrf.mxu1 }
 0x5e2   : > { %v3381_v60 = vld [vmem:[%s4225_s11] sm:$0xff]  }
 0x5e3   : > { %v837_v62 = vpop.f32.mrf.mxu1 }
 0x5e5   : > { %v3149_v63 = vpop.f32.mrf.mxu1 }
 0x5ec   : > { %v957_v2 = vpop.f32.mrf.mxu1 }
 0x5ee   : > { %v3160_v4 = vpop.f32.mrf.mxu1 }
 0x5f0   : > { %v960_v5 = vpop.f32.mrf.mxu1 }
 0x5f1   : > { %v3346_v8 = vpack.i.bf16 %v960_v5, %v957_v2 }
 0x5f2   : > { %v3161_v10 = vpop.f32.mrf.mxu1 }
 0x5f3   : > { %3347 = vrot.lane.b32.xlu1 %v3346_v8, %s4235_s22  ;;  %s4253_s22 = sld [smem:[#allocation7_spill]] }
 0x5f4   : > { %v1078_v11 = vpop.f32.mrf.mxu1 }
 0x5f6   : > { %v3172_v12 = vpop.f32.mrf.mxu1 }
 0x5f8   : > { %v1081_v14 = vpop.f32.mrf.mxu1 }
 0x5f9   : > { %v3351_v16 = vpack.i.bf16 %v1081_v14, %v1078_v11  ;;  %v2912_v11 = vld [vmem:[%s4223_s9] ss:$0 sm:$0xff] }
 0x5fa   : > { %v3173_v17 = vpop.f32.mrf.mxu1 }
 0x5fb   : > { %3352 = vrot.lane.b32.xlu0 %v3351_v16, %s4234_s30  ;;  %v2913_v16 = vld [vmem:[%s4253_s22] ss:$0 sm:$0xff] }
 0x5fc   : > { %v1201_v18 = vpop.f32.mrf.mxu1 }
 0x5fe   : > { %v3184_v19 = vpop.f32.mrf.mxu1 }
 0x600   : > { %v1204_v20 = vpop.f32.mrf.mxu1 }
 0x601   : > { %v3356_v21 = vpack.i.bf16 %v1204_v20, %v1201_v18 }
 0x602   : > { %v3185_v22 = vpop.f32.mrf.mxu1 }
 0x603   : > { %3357 = vrot.lane.b32.xlu1 %v3356_v21, %s4233_s18  ;;  %v3382_v21 = vld [vmem:[%s4227_s13 + $0x38] sm:$0xff]   ;;  %v3383_v22 = vld [vmem:[%s4227_s13 + $0x30] sm:$0xff]  }
 0x665   : > { %v3348_v23 = vpop.permute.xlu1 %3347 }
 0x666   : > { %v3350_v25 = vunpack.i.h.bf16 %v3348_v23  ;;  %v3349_v26 = vunpack.i.l.bf16 %v3348_v23  ;;  %v3384_v23 = vld [vmem:[%s4227_s13 + $0x28] sm:$0xff]  }
 0x668   : > { %v1233_v30 = vsel %vm718_vm3, %v837_v62, %v3350_v25  ;;  %v1232_v31 = vsel %vm718_vm3, %v834_v58, %v3349_v26  ;;  %v3380_v58 = vld [vmem:[%s4225_s11 + $0x8] sm:$0xff]   ;;  %v3386_v25 = vld [vmem:[%s4227_s13 + $0x18] sm:$0xff]   ;;  %v3387_v26 = vld [vmem:[%s4227_s13 + $0x10] sm:$0xff]  }
 0x669   : > { %3195 = vmatpush3.bf16.msra.mxu1 %v3380_v58 }
 0x66a   : > { %3196 = vmatprep.subr.bf16.mxu1 %v3519_v15 }
 0x66d   : > { %v3353_v24 = vpop.permute.xlu0 %3352  ;;  %3197 = vmatpush3.bf16.msra.mxu1 %v3381_v60 }
 0x66e   : > { %v3355_v27 = vunpack.i.h.bf16 %v3353_v24  ;;  %v3354_v28 = vunpack.i.l.bf16 %v3353_v24  ;;  %3222 = vmatprep.subr.bf16.mxu1 %v3519_v15  ;;  %v3385_v24 = vld [vmem:[%s4227_s13 + $0x20] sm:$0xff]  }
 0x670   : > { %v1234_v34 = vsel %vm769_vm9, %v1232_v31, %v3354_v28  ;;  %v1235_v35 = vsel %vm769_vm9, %v1233_v30, %v3355_v27  ;;  %v3388_v27 = vld [vmem:[%s4227_s13 + $0x8] sm:$0xff]   ;;  %v3389_v28 = vld [vmem:[%s4227_s13] sm:$0xff]  }
 0x675   : > { %v3358_v29 = vpop.permute.xlu1 %3357 }
 0x676   : > { %v3360_v32 = vunpack.i.h.bf16 %v3358_v29  ;;  %v3359_v33 = vunpack.i.l.bf16 %v3358_v29  ;;  %v2914_v29 = vld [vmem:[%s4226_s12] ss:$0 sm:$0xff] }
 0x678   : > { %v1237_v36 = vsel %vm1236_vm11, %v1234_v34, %v3359_v33  ;;  %v1238_v37 = vsel %vm1236_vm11, %v1235_v35, %v3360_v32 }
 0x679   : > { %v1239_v41 = vpack.c.bf16 %v1238_v37, %v1237_v36 }
 0x67b   : > { %3191 = vmatmul.mubr.msk.bf16.vlgmr.msra.gmra.mxu0 %vm563_vm0, %v1239_v41 }
 0x67c   : > { %3218 = vmatprep.mubr.msk.bf16.mxu0 %vm3520_vm1, %v3519_v15  ;;  %3203 = vmatpush3.bf16.msra.mxu0 %v3382_v21 }
 0x67d   : > { %3204 = vmatprep.subr.bf16.mxu0 %v3519_v15 }
 0x680   : > { %3205 = vmatpush3.bf16.msra.mxu0 %v3383_v22 }
 0x681   : > { %3206 = vmatprep.subr.bf16.mxu0 %v3519_v15 }
 0x684   : > { %3207 = vmatpush3.bf16.msra.mxu0 %v3384_v23 }
 0x685   : > { %3208 = vmatprep.subr.bf16.mxu0 %v3519_v15 }
 0x688   : > { %3209 = vmatpush3.bf16.msra.mxu0 %v3385_v24 }
 0x689   : > { %3210 = vmatprep.subr.bf16.mxu0 %v3519_v15 }
 0x68c   : > { %3211 = vmatpush3.bf16.msra.mxu0 %v3386_v25 }
 0x68d   : > { %3212 = vmatprep.subr.bf16.mxu0 %v3519_v15 }
 0x690   : > { %3213 = vmatpush3.bf16.msra.mxu0 %v3387_v26 }
 0x691   : > { %3214 = vmatprep.subr.bf16.mxu0 %v3519_v15 }
 0x694   : > { %3215 = vmatpush3.bf16.msra.mxu0 %v3388_v27 }
 0x695   : > { %3216 = vmatprep.subr.bf16.mxu0 %v3519_v15 }
 0x698   : > { %3217 = vmatpush3.bf16.msra.mxu0 %v3389_v28  ;;  %v2929_v28 = vld [vmem:[%s4217_s3 + $0x1] ss:$0 sm:$0xff] }
 0x699   : > { %3248 = vmatprep.subr.bf16.mxu0 %v3519_v15 }
 0x73b   : > { %v1293_v38 = vpop.f32.mrf.mxu0 }
 0x73c   : > { %v1300_v40 = vadd.f32 %v1293_v38, %v3646_v0 }
 0x73d   : > { %v3192_v42 = vpop.f32.mrf.mxu0 }
 0x73e   : > { %v3818_v43 = vadd.f32 %v2911_v39, %v1300_v40 }
 0x73f   : > { %v1296_v44 = vpop.f32.mrf.mxu0 }
 0x740   : > { %v1301_v45 = vadd.f32 %v1296_v44, %v3648_v1  ;;  %v1313_v46 = vsel %vm563_vm0, %v3818_v43, 0.0 }
 0x741   : > { %1314 = vadd.xlane.f32.xlu0 %v1313_v46  ;;  %v3193_v47 = vpop.f32.mrf.mxu0 }
 0x742   : > { %v3823_v48 = vadd.f32 %v2911_v39, %v1301_v45 }
 0x744   : > { %v1316_v49 = vsel %vm563_vm0, %v3823_v48, 0.0 }
 0x745   : > { %1317 = vadd.xlane.f32.xlu1 %v1316_v49 }
 0x7ca   : > { %v1315_v50 = vpop.xlane.xlu0 %1314 }
 0x7cb   : > { %v1319_v51 = vmul.f32 0.03125, %v1315_v50 }
 0x7cd   : > { %v1321_v0 = vsub.f32 %v3818_v43, %v1319_v51 }
 0x7ce   : > { %v1318_v52 = vpop.xlane.xlu1 %1317 }
 0x7cf   : > { %v1320_v53 = vmul.f32 0.03125, %v1318_v52  ;;  %v1323_v54 = vmul.f32 %v1321_v0, %v1321_v0 }
 0x7d1   : > { %v1322_v1 = vsub.f32 %v3823_v48, %v1320_v53  ;;  %v1325_v55 = vsel %vm563_vm0, %v1323_v54, 0.0 }
 0x7d2   : > { %1326 = vadd.xlane.f32.xlu0 %v1325_v55 }
 0x7d3   : > { %v1324_v56 = vmul.f32 %v1322_v1, %v1322_v1 }
 0x7d5   : > { %v1328_v57 = vsel %vm563_vm0, %v1324_v56, 0.0  ;;  %v2926_v56 = vld [vmem:[%s4228_s14] ss:$0 sm:$0xff] }
 0x7d6   : > { %1329 = vadd.xlane.f32.xlu0 %v1328_v57 }
 0x85b   : > { %v1327_v62 = vpop.xlane.xlu0 %1326 }
 0x85c   : > { %v1331_v63 = vmul.f32 0.03125, %v1327_v62 }
 0x85e   : > { %v1333_v2 = vadd.f32 1e-05, %v1331_v63 }
 0x85f   : > { %v1330_v4 = vpop.xlane.xlu0 %1329 }
 0x860   : > { %3440 = vrsqrt.f32 %v1333_v2  ;;  %v1332_v5 = vmul.f32 0.03125, %v1330_v4 }
 0x862   : > { %v1334_v7 = vadd.f32 1e-05, %v1332_v5 }
 0x864   : > { %3442 = vrsqrt.f32 %v1334_v7 }
 0x86d   : > { %v3441_v8 = vpop.eup %3440 }
 0x86e   : > { %v1337_v10 = vmul.f32 %v3441_v8, %v1321_v0 }
 0x870   : > { %v1345_v14 = vmul.f32 %v2912_v11, %v1337_v10 }
 0x871   : > { %v3443_v12 = vpop.eup %3442 }
 0x872   : > { %v1338_v13 = vmul.f32 %v3443_v12, %v1322_v1  ;;  %v1353_v18 = vadd.f32 %v2913_v16, %v1345_v14 }
 0x874   : > { %v1346_v17 = vmul.f32 %v2912_v11, %v1338_v13 }
 0x876   : > { %v1354_v19 = vadd.f32 %v2913_v16, %v1346_v17 }
 0x878   : > { %v1355_v20 = vpack.c.bf16 %v1354_v19, %v1353_v18  ;;  %v3390_v18 = vld [vmem:[%s4219_s5 + $0x18] sm:$0xff]   ;;  %v3391_v19 = vld [vmem:[%s4219_s5 + $0x10] sm:$0xff]  }
 0x87a   : > { %3199 = vmatmul.mubr.msk.bf16.vlgmr.msra.gmra.mxu1 %vm563_vm0, %v1355_v20 }
 0x87b   : > { %3226 = vmatprep.mubr.msk.bf16.mxu1 %vm3520_vm1, %v3519_v15  ;;  %3223 = vmatpush3.bf16.msra.mxu1 %v3390_v18 }
 0x87c   : > { %3224 = vmatprep.subr.bf16.mxu1 %v3519_v15 }
 0x87f   : > { %3225 = vmatpush3.bf16.msra.mxu1 %v3391_v19 }
 0x880   : > { %3230 = vmatprep.subr.bf16.mxu1 %v3519_v15 }
 0x93a   : > { %v1416_v30 = vpop.f32.mrf.mxu1 }
 0x93b   : > { %v1417_v31 = vadd.f32 %v2914_v29, %v1416_v30 }
 0x93c   : > { %v3200_v32 = vpop.f32.mrf.mxu1 }
 0x93d   : > { %v1425_v33 = vmul.f32 0.044715, %v1417_v31  ;;  %v1423_v51 = vmul.f32 0.5, %v1417_v31  ;;  %v2930_v32 = vld [vmem:[%s4218_s4 + $0x1] ss:$0 sm:$0xff] }
 0x93e   : > { %v1419_v34 = vpop.f32.mrf.mxu1 }
 0x93f   : > { %v1427_v35 = vmul.f32 %v1425_v33, %v1417_v31  ;;  %v1420_v36 = vadd.f32 %v2914_v29, %v1419_v34 }
 0x940   : > { %v3201_v37 = vpop.f32.mrf.mxu1 }
 0x941   : > { %v1429_v41 = vmul.f32 %v1427_v35, %v1417_v31  ;;  %v1426_v38 = vmul.f32 0.044715, %v1420_v36  ;;  %v1424_v0 = vmul.f32 0.5, %v1420_v36  ;;  %v2936_v37 = vld [vmem:[%s4220_s6 + $0x1] ss:$0 sm:$0xff] }
 0x943   : > { %v1431_v39 = vadd.f32 %v1429_v41, %v1417_v31  ;;  %v1428_v40 = vmul.f32 %v1426_v38, %v1420_v36 }
 0x945   : > { %v1433_v42 = vmul.f32 0.7978846, %v1431_v39  ;;  %v1430_v44 = vmul.f32 %v1428_v40, %v1420_v36 }
 0x947   : > { %3444 = vtanh.f32 %v1433_v42  ;;  %v1432_v45 = vadd.f32 %v1430_v44, %v1420_v36 }
 0x949   : > { %v1434_v46 = vmul.f32 0.7978846, %v1432_v45 }
 0x94b   : > { %3446 = vtanh.f32 %v1434_v46 }
 0x954   : > { %v3445_v47 = vpop.eup %3444 }
 0x955   : > { %v1437_v49 = vadd.f32 1.0, %v3445_v47 }
 0x957   : > { %v1439_v53 = vmul.f32 %v1437_v49, %v1423_v51 }
 0x958   : > { %v3447_v50 = vpop.eup %3446 }
 0x959   : > { %v1438_v52 = vadd.f32 1.0, %v3447_v50 }
 0x95b   : > { %v1440_v54 = vmul.f32 %v1438_v52, %v1424_v0 }
 0x95d   : > { %v1441_v1 = vpack.c.bf16 %v1440_v54, %v1439_v53 }
 0x95f   : > { %3219 = vmatmul.mubr.bf16.vlgmr.msra.gmra.mxu0 %v1441_v1 }
 0x960   : > { %3250 = vmatprep.mubr.msk.bf16.mxu0 %vm3520_vm1, %v3519_v15 }
 0xa1f   : > { %v1540_v55 = vpop.f32.mrf.mxu0 }
 0xa20   : > { %v1547_v57 = vadd.f32 %v1540_v55, %v3818_v43 }
 0xa21   : > { %v3220_v58 = vpop.f32.mrf.mxu0 }
 0xa22   : > { %v3889_v60 = vadd.f32 %v2926_v56, %v1547_v57 }
 0xa23   : > { %v1543_v62 = vpop.f32.mrf.mxu0 }
 0xa24   : > { %v1548_v63 = vadd.f32 %v1543_v62, %v3823_v48  ;;  %v1562_v2 = vsel %vm563_vm0, %v3889_v60, 0.0 }
 0xa25   : > { %1563 = vadd.xlane.f32.xlu0 %v1562_v2  ;;  %v3221_v4 = vpop.f32.mrf.mxu0 }
 0xa26   : > { %v3894_v5 = vadd.f32 %v2926_v56, %v1548_v63 }
 0xa28   : > { %v1565_v7 = vsel %vm563_vm0, %v3894_v5, 0.0 }
 0xa29   : > { %1566 = vadd.xlane.f32.xlu1 %v1565_v7 }
 0xaae   : > { %v1564_v8 = vpop.xlane.xlu0 %1563 }
 0xaaf   : > { %v1568_v10 = vmul.f32 0.03125, %v1564_v8 }
 0xab1   : > { %v1570_v43 = vsub.f32 %v3889_v60, %v1568_v10 }
 0xab2   : > { %v1567_v11 = vpop.xlane.xlu1 %1566 }
 0xab3   : > { %v1569_v12 = vmul.f32 0.03125, %v1567_v11  ;;  %v1572_v13 = vmul.f32 %v1570_v43, %v1570_v43 }
 0xab5   : > { %v1571_v48 = vsub.f32 %v3894_v5, %v1569_v12  ;;  %v1574_v14 = vsel %vm563_vm0, %v1572_v13, 0.0 }
 0xab6   : > { %1575 = vadd.xlane.f32.xlu0 %v1574_v14 }
 0xab7   : > { %v1573_v16 = vmul.f32 %v1571_v48, %v1571_v48 }
 0xab9   : > { %v1577_v17 = vsel %vm563_vm0, %v1573_v16, 0.0 }
 0xaba   : > { %1578 = vadd.xlane.f32.xlu1 %v1577_v17 }
 0xb3f   : > { %v1576_v20 = vpop.xlane.xlu0 %1575 }
 0xb40   : > { %v1580_v21 = vmul.f32 0.03125, %v1576_v20 }
 0xb42   : > { %v1582_v22 = vadd.f32 1e-05, %v1580_v21 }
 0xb43   : > { %v1579_v23 = vpop.xlane.xlu1 %1578 }
 0xb44   : > { %3448 = vrsqrt.f32 %v1582_v22  ;;  %v1581_v24 = vmul.f32 0.03125, %v1579_v23 }
 0xb46   : > { %v1583_v25 = vadd.f32 1e-05, %v1581_v24 }
 0xb48   : > { %3450 = vrsqrt.f32 %v1583_v25 }
 0xb51   : > { %v3449_v26 = vpop.eup %3448 }
 0xb52   : > { %v1586_v27 = vmul.f32 %v3449_v26, %v1570_v43 }
 0xb54   : > { %v1594_v31 = vmul.f32 %v2929_v28, %v1586_v27 }
 0xb55   : > { %v3451_v29 = vpop.eup %3450 }
 0xb56   : > { %v1587_v30 = vmul.f32 %v3451_v29, %v1571_v48  ;;  %v1602_v34 = vadd.f32 %v2930_v32, %v1594_v31 }
 0xb58   : > { %v1595_v33 = vmul.f32 %v2929_v28, %v1587_v30 }
 0xb5a   : > { %v1603_v35 = vadd.f32 %v2930_v32, %v1595_v33 }
 0xb5c   : > { %v1604_v36 = vpack.c.bf16 %v1603_v35, %v1602_v34 }
 0xb5e   : > { %3227 = vmatmul.mubr.msk.bf16.vlgmr.msra.gmra.mxu1 %vm563_vm0, %v1604_v36 }
 0xb5f   : > { %3232 = vmatprep.mubr.msk.bf16.mxu1 %vm3520_vm1, %v3519_v15 }
 0xc1e   : > { %v1667_v41 = vpop.f32.mrf.mxu1 }
 0xc1f   : > { %v1668_v38 = vadd.f32 %v2936_v37, %v1667_v41 }
 0xc20   : > { %v3228_v39 = vpop.f32.mrf.mxu1 }
 0xc21   : > { %1677 = vrot.lane.b32.xlu0 %v1668_v38, %s4240_s19 }
 0xc22   : > { %v1670_v40 = vpop.f32.mrf.mxu1 }
 0xc23   : > { %v1671_v42 = vadd.f32 %v2936_v37, %v1670_v40 }
 0xc24   : > { %v3229_v44 = vpop.f32.mrf.mxu1 }
 0xc25   : > { %v3923_v45 = vpack.c.bf16 %v1671_v42, %v1668_v38  ;;  %1679 = vrot.lane.b32.xlu1 %v1671_v42, %s4240_s19 }
 0xc93   : > { %v1678_v46 = vpop.permute.xlu0 %1677 }
 0xc94   : > { %1683 = vxpose.xlu1.b32.start [1/2] (short) (narrow) %v1678_v46, 32 }
 0xc97   : > { %v1680_v47 = vpop.permute.xlu1 %1679 }
 0xc98   : > { %1684 = vxpose.xlu1.b32.end [2/2] (short) (narrow) %v1680_v47, 32 }
 0xcbe   : > { %1790 = vrot.lane.b32.xlu1 %v3923_v45, %s4242_s25 }
 0xd10   : > { %v1699_v49 = vpop.trf.xlu1 }
 0xd14   : > { %v1700_v50 = vpop.trf.xlu1 }
 0xd15   : > { %v1715_v51 = vpack.c.bf16 %v1700_v50, %v1699_v49 }
 0xd17   : > { %v1721_v0 = vsel %vm722_vm2, %v1715_v51, 0  ;;  %v1840_v21 = vrot.slane %v1715_v51, 4 }
 0xd18   : > { %3231 = vmatpush3.bf16.msra.mxu1 %v1721_v0  ;;  %v1701_v52 = vpop.trf.xlu1 }
 0xd19   : > { %3236 = vmatprep.subr.bf16.mxu1 %v3519_v15  ;;  %v1845_v25 = vsel %vm722_vm2, %v1840_v21, 0 }
 0xd1b   : > { %3233 = vmatmul.mubr.msk.bf16.vlgmr.msra.gmra.mxu1 %vm718_vm3, %v3923_v45 }
 0xd1c   : > { %v1702_v53 = vpop.trf.xlu1  ;;  %3238 = vmatprep.mubr.msk.bf16.mxu1 %vm3520_vm1, %v3519_v15 }
 0xd1d   : > { %v1716_v54 = vpack.c.bf16 %v1702_v53, %v1701_v52 }
 0xd1f   : > { %v1966_v27 = vsel %vm722_vm2, %v1716_v54, 0  ;;  %v2084_v28 = vrot.slane %v1716_v54, 4 }
 0xd21   : > { %v2089_v30 = vsel %vm722_vm2, %v2084_v28, 0 }
 0xd30   : > { %v1791_v1 = vpop.permute.xlu1 %1790 }
 0xd31   : > { %3237 = vmatpush3.bf16.msra.mxu1 %v1791_v1 }
 0xd32   : > { %3242 = vmatprep.subr.bf16.mxu1 %v3519_v15 }
 0xddb   : > { %v1757_v55 = vpop.f32.mrf.mxu1 }
 0xddc   : > { %v1764_v56 = vsel %vm3729_vm7, %v1757_v55, -1e+09 }
 0xddd   : > { %v3234_v57 = vpop.f32.mrf.mxu1  ;;  %v1766_v58 = vsel %vm769_vm9, %v1764_v56, -inf }
 0xdde   : > { %1767 = vmax.xlane.f32.xlu0 %v1766_v58 }
 0xddf   : > { %v1760_v62 = vpop.f32.mrf.mxu1 }
 0xde0   : > { %v1765_v63 = vsel %vm3736_vm10, %v1760_v62, -1e+09 }
 0xde1   : > { %v3235_v2 = vpop.f32.mrf.mxu1  ;;  %v1769_v4 = vsel %vm769_vm9, %v1765_v63, -inf }
 0xde2   : > { %1770 = vmax.xlane.f32.xlu0 %v1769_v4 }
 0xe67   : > { %v1768_v7 = vpop.xlane.xlu0 %1767 }
 0xe68   : > { %v1772_v8 = vsub.f32 %v1764_v56, %v1768_v7 }
 0xe6a   : > { %v1774_v10 = vmul.f32 1.442695, %v1772_v8 }
 0xe6b   : > { %v1771_v43 = vpop.xlane.xlu0 %1770 }
 0xe6c   : > { %3452 = vpow2.f32 %v1774_v10  ;;  %v1773_v11 = vsub.f32 %v1765_v63, %v1771_v43 }
 0xe6e   : > { %v1776_v12 = vmul.f32 1.442695, %v1773_v11 }
 0xe70   : > { %3454 = vpow2.f32 %v1776_v12 }
 0xe79   : > { %v3453_v13 = vpop.eup %3452 }
 0xe7a   : > { %v1778_v48 = vsel %vm769_vm9, %v3453_v13, 0.0 }
 0xe7b   : > { %1779 = vadd.xlane.f32.xlu0 %v1778_v48 }
 0xe7d   : > { %v3455_v14 = vpop.eup %3454 }
 0xe7e   : > { %v1781_v16 = vsel %vm769_vm9, %v3455_v14, 0.0 }
 0xe7f   : > { %1782 = vadd.xlane.f32.xlu0 %v1781_v16 }
 0xe95   : > { %1837 = vrot.lane.b32.xlu0 %v3923_v45, %s3522_s1  ;;  %s4255_s1 = smov 48  }
 0xe99   : > { %1960 = vrot.lane.b32.xlu0 %v3923_v45, %s3523_s20  ;;  %s4256_s20 = smov 56  }
 0xe9d   : > { %2081 = vrot.lane.b32.xlu0 %v3923_v45, %s4254_s26  ;;  %s4260_s26 = smov 24  }
 0xf04   : > { %v1780_v17 = vpop.xlane.xlu0 %1779 }
 0xf05   : > { %3456 = vrcp.f32 %v1780_v17 }
 0xf08   : > { %v1783_v18 = vpop.xlane.xlu0 %1782 }
 0xf09   : > { %3458 = vrcp.f32 %v1783_v18 }
 0xf0c   : > { %v1838_v26 = vpop.permute.xlu0 %1837 }
 0xf10   : > { %v1961_v29 = vpop.permute.xlu0 %1960 }
 0xf12   : > { %v3457_v19 = vpop.eup %3456 }
 0xf13   : > { %v1786_v22 = vmul.f32 %v3457_v19, %v3453_v13 }
 0xf14   : > { %v2082_v31 = vpop.permute.xlu0 %2081 }
 0xf16   : > { %v3459_v20 = vpop.eup %3458 }
 0xf17   : > { %v1787_v23 = vmul.f32 %v3459_v20, %v3455_v14 }
 0xf19   : > { %v1788_v24 = vpack.c.bf16 %v1787_v23, %v1786_v22 }
 0xf1b   : > { %3239 = vmatmul.mubr.msk.bf16.vlgmr.msra.gmra.mxu1 %vm769_vm9, %v1788_v24 }
 0xf1c   : > { %3243 = vmatpush3.bf16.msra.mxu1 %v1845_v25  ;;  %3244 = vmatprep.mubr.msk.bf16.mxu1 %vm3520_vm1, %v3519_v15 }
 0xf1d   : > { %3254 = vmatprep.subr.bf16.mxu1 %v3519_v15 }
 0xf23   : > { %3245 = vmatmul.mubr.msk.bf16.vlgmr.msra.gmra.mxu1 %vm718_vm3, %v1838_v26 }
 0xf24   : > { %3255 = vmatpush3.bf16.msra.mxu1 %v1966_v27  ;;  %3256 = vmatprep.mubr.msk.bf16.mxu1 %vm3520_vm1, %v3519_v15 }
 0xf25   : > { %3266 = vmatprep.subr.bf16.mxu1 %v3519_v15 }
 0xf2b   : > { %3257 = vmatmul.mubr.msk.bf16.vlgmr.msra.gmra.mxu1 %vm718_vm3, %v1961_v29 }
 0xf2c   : > { %3267 = vmatpush3.bf16.msra.mxu1 %v2089_v30  ;;  %3268 = vmatprep.mubr.msk.bf16.mxu1 %vm3520_vm1, %v3519_v15 }
 0xf2d   : > { %3278 = vmatprep.subr.bf16.mxu1 %v3519_v15 }
 0xf33   : > { %3269 = vmatmul.mubr.msk.bf16.vlgmr.msra.gmra.mxu1 %vm718_vm3, %v2082_v31 }
 0xf34   : > { %3282 = vmatprep.mubr.msk.bf16.mxu1 %vm3520_vm1, %v3519_v15 }
 0xfdb   : > { %v3967_v32 = vpop.f32.mrf.mxu1 }
 0xfdd   : > { %v3240_v33 = vpop.f32.mrf.mxu1 }
 0xfdf   : > { %v3969_v34 = vpop.f32.mrf.mxu1 }
 0xfe1   : > { %v3241_v35 = vpop.f32.mrf.mxu1 }
 0xfe3   : > { %v1881_v36 = vpop.f32.mrf.mxu1 }
 0xfe4   : > { %v1888_v37 = vsel %vm3729_vm7, %v1881_v36, -1e+09 }
 0xfe5   : > { %v3246_v41 = vpop.f32.mrf.mxu1  ;;  %v1890_v38 = vsel %vm769_vm9, %v1888_v37, -inf }
 0xfe6   : > { %1891 = vmax.xlane.f32.xlu0 %v1890_v38 }
 0xfe7   : > { %v1884_v39 = vpop.f32.mrf.mxu1 }
 0xfe8   : > { %v1889_v40 = vsel %vm3736_vm10, %v1884_v39, -1e+09 }
 0xfe9   : > { %v3247_v42 = vpop.f32.mrf.mxu1  ;;  %v1893_v44 = vsel %vm769_vm9, %v1889_v40, -inf }
 0xfea   : > { %1894 = vmax.xlane.f32.xlu1 %v1893_v44 }
 0xfeb   : > { %v2002_v46 = vpop.f32.mrf.mxu1 }
 0xfec   : > { %v2009_v47 = vsel %vm3729_vm7, %v2002_v46, -1e+09 }
 0xfed   : > { %v3258_v49 = vpop.f32.mrf.mxu1  ;;  %v2011_v50 = vsel %vm769_vm9, %v2009_v47, -inf }
 0xfee   : > { %2012 = vmax.xlane.f32.xlu0 %v2011_v50 }
 0xfef   : > { %v2005_v51 = vpop.f32.mrf.mxu1 }
 0xff0   : > { %v2010_v0 = vsel %vm3736_vm10, %v2005_v51, -1e+09 }
 0xff1   : > { %v3259_v52 = vpop.f32.mrf.mxu1  ;;  %v2014_v53 = vsel %vm769_vm9, %v2010_v0, -inf }
 0xff2   : > { %2015 = vmax.xlane.f32.xlu0 %v2014_v53 }
 0xff3   : > { %v2125_v54 = vpop.f32.mrf.mxu1 }
 0xff4   : > { %v2132_v1 = vsel %vm3729_vm7, %v2125_v54, -1e+09 }
 0xff5   : > { %v3270_v55 = vpop.f32.mrf.mxu1  ;;  %v2134_v56 = vsel %vm769_vm9, %v2132_v1, -inf }
 0xff6   : > { %2135 = vmax.xlane.f32.xlu0 %v2134_v56 }
 0xff7   : > { %v2128_v57 = vpop.f32.mrf.mxu1 }
 0xff8   : > { %v2133_v58 = vsel %vm3736_vm10, %v2128_v57, -1e+09  ;;  %vm2655_vm10 = vcmp.eq.s32.totalorder %v3720_v61, 4 }
 0xff9   : > { %v3271_v62 = vpop.f32.mrf.mxu1  ;;  %v2137_v63 = vsel %vm769_vm9, %v2133_v58, -inf }
 0xffa   : > { %2138 = vmax.xlane.f32.xlu1 %v2137_v63 }
0x106f   : > { %v1892_v2 = vpop.xlane.xlu0 %1891 }
0x1070   : > { %v1896_v4 = vsub.f32 %v1888_v37, %v1892_v2 }
0x1072   : > { %v1898_v7 = vmul.f32 1.442695, %v1896_v4  ;;  %v3392_v4 = vld [vmem:[%s4221_s7 + $0x18] sm:$0xff]  }
0x1073   : > { %v1895_v8 = vpop.xlane.xlu1 %1894  ;;  %3279 = vmatpush3.bf16.msra.mxu1 %v3392_v4 }
0x1074   : > { %3460 = vpow2.f32 %v1898_v7  ;;  %v1897_v10 = vsub.f32 %v1889_v40, %v1895_v8  ;;  %3280 = vmatprep.subr.bf16.mxu1 %v3519_v15 }
0x1076   : > { %v1900_v6 = vmul.f32 1.442695, %v1897_v10 }
0x1077   : > { %v2013_v43 = vpop.xlane.xlu0 %2012 }
0x1078   : > { %3462 = vpow2.f32 %v1900_v6  ;;  %v2017_v11 = vsub.f32 %v2009_v47, %v2013_v43 }
0x107a   : > { %v2019_v12 = vmul.f32 1.442695, %v2017_v11 }
0x107b   : > { %v2016_v13 = vpop.xlane.xlu0 %2015 }
0x107c   : > { %3464 = vpow2.f32 %v2019_v12  ;;  %v2018_v48 = vsub.f32 %v2010_v0, %v2016_v13  ;;  %v3393_v13 = vld [vmem:[%s4221_s7 + $0x10] sm:$0xff]  }
0x107d   : > { %3281 = vmatpush3.bf16.msra.mxu1 %v3393_v13 }
0x107e   : > { %v2021_v9 = vmul.f32 1.442695, %v2018_v48  ;;  %3294 = vmatprep.subr.bf16.mxu1 %v3519_v15 }
0x107f   : > { %v2136_v14 = vpop.xlane.xlu0 %2135 }
0x1080   : > { %3466 = vpow2.f32 %v2021_v9  ;;  %v2140_v16 = vsub.f32 %v2132_v1, %v2136_v14 }
0x1081   : > { %v3461_v17 = vpop.eup %3460 }
0x1082   : > { %v2142_v18 = vmul.f32 1.442695, %v2140_v16  ;;  %v1902_v19 = vsel %vm769_vm9, %v3461_v17, 0.0 }
0x1083   : > { %1903 = vadd.xlane.f32.xlu0 %v1902_v19  ;;  %v2139_v28 = vpop.xlane.xlu1 %2138 }
0x1084   : > { %3468 = vpow2.f32 %v2142_v18  ;;  %v2141_v29 = vsub.f32 %v2133_v58, %v2139_v28 }
0x1085   : > { %v3463_v20 = vpop.eup %3462 }
0x1086   : > { %v1905_v21 = vsel %vm769_vm9, %v3463_v20, 0.0  ;;  %v2144_v30 = vmul.f32 1.442695, %v2141_v29 }
0x1087   : > { %1906 = vadd.xlane.f32.xlu1 %v1905_v21 }
0x1088   : > { %3470 = vpow2.f32 %v2144_v30 }
0x1089   : > { %v3465_v22 = vpop.eup %3464 }
0x108a   : > { %v2023_v23 = vsel %vm769_vm9, %v3465_v22, 0.0 }
0x108b   : > { %2024 = vadd.xlane.f32.xlu0 %v2023_v23 }
0x108d   : > { %v3467_v24 = vpop.eup %3466 }
0x108e   : > { %v2026_v25 = vsel %vm769_vm9, %v3467_v24, 0.0 }
0x108f   : > { %2027 = vadd.xlane.f32.xlu1 %v2026_v25 }
0x1091   : > { %v3469_v26 = vpop.eup %3468 }
0x1092   : > { %v2146_v27 = vsel %vm769_vm9, %v3469_v26, 0.0 }
0x1093   : > { %2147 = vadd.xlane.f32.xlu0 %v2146_v27 }
0x1095   : > { %v3471_v31 = vpop.eup %3470 }
0x1096   : > { %v2149_v33 = vsel %vm769_vm9, %v3471_v31, 0.0 }
0x10a0   : > { %2034 = vrot.lane.b32.xlu1 %v3923_v45, %s4255_s1  ;;  %s4121_s1 = sshll.u32 %s3634_s0, 7 }
0x10a1   : > { %s2627_s28 = sadd.s32 2, %s4121_s1  ;;  %s2649_s0 = sadd.s32 4, %s4121_s1 }
0x10a2   : > { %s2660_s19 = sadd.s32 5, %s4121_s1 }
0x10a9   : > { %1913 = vrot.lane.b32.xlu0 %v3923_v45, %s4256_s20  ;;  %s2606_s20 = sld [smem:[#allocation3 + %s4121_s1]] }
0x10af   : > { %p2607_p9 = scmp.gt.s32.totalorder %s2606_s20, 0  ;;  %p2999_p11 = scmp.lt.s32.totalorder %s2606_s20, 15 }
0x10b1   : > { %s2608_s18 = scalar_select %p2607_p9, %s2606_s20, 0 }
0x10b2   : > { %s2682_s20 = sadd.s32 7, %s4121_s1 }
0x10b3   : > { %s4270_s18 = smov (!%p2999_p11, %s2608_s18), 15  ;;  %s4143_s25 = sld [smem:[#allocation3 + %s2682_s20]] }
0x10b9   : > { %p2684_p9 = scmp.gt.s32.totalorder %s4143_s25, 0 }
0x10c4   : > { %2150 = vadd.xlane.f32.xlu1 %v2149_v33 }
0x10d5   : > { %2157 = vrot.lane.b32.xlu1 %v3923_v45, %s4257_s21  ;;  %s2616_s21 = sadd.s32 1, %s4121_s1 }
0x10d6   : > { %s2617_s27 = sld [smem:[#allocation3 + %s2616_s21]]  ;;  %s2671_s21 = sadd.s32 6, %s4121_s1 }
0x10dc   : > { %p2618_p10 = scmp.gt.s32.totalorder %s2617_s27, 0  ;;  %p3004_p12 = scmp.lt.s32.totalorder %s2617_s27, 15 }
0x10de   : > { %s4268_s27 = smov (!%p2618_p10, %s2617_s27), 0  ;;  %p3034_p10 = scmp.lt.s32.totalorder %s4143_s25, 15 }
0x10df   : > { %s4272_s27 = smov (!%p3004_p12, %s4268_s27), 15  ;;  %s4286_s25 = smov (!%p2684_p9, %s4143_s25), 0 }
0x10e0   : > { %s4290_s25 = smov (!%p3034_p10, %s4286_s25), 15 }
0x110c   : > { %v1904_v35 = vpop.xlane.xlu0 %1903 }
0x110d   : > { %3472 = vrcp.f32 %v1904_v35 }
0x1110   : > { %v1907_v36 = vpop.xlane.xlu1 %1906 }
0x1111   : > { %3474 = vrcp.f32 %v1907_v36 }
0x1114   : > { %v2025_v37 = vpop.xlane.xlu0 %2024 }
0x1115   : > { %3476 = vrcp.f32 %v2025_v37 }
0x1118   : > { %v2028_v41 = vpop.xlane.xlu1 %2027 }
0x1119   : > { %3478 = vrcp.f32 %v2028_v41 }
0x111a   : > { %v3473_v38 = vpop.eup %3472 }
0x111b   : > { %v1910_v42 = vmul.f32 %v3473_v38, %v3461_v17 }
0x111c   : > { %v2148_v39 = vpop.xlane.xlu0 %2147  ;;  %v2035_v45 = vpop.permute.xlu1 %2034 }
0x111d   : > { %3480 = vrcp.f32 %v2148_v39 }
0x111e   : > { %v3475_v40 = vpop.eup %3474 }
0x111f   : > { %v1911_v44 = vmul.f32 %v3475_v40, %v3463_v20 }
0x1120   : > { %v1914_v46 = vpop.permute.xlu0 %1913 }
0x1121   : > { %3249 = vmatpush3.bf16.msra.mxu0 %v1914_v46  ;;  %v1912_v47 = vpack.c.bf16 %v1911_v44, %v1910_v42 }
0x1122   : > { %3260 = vmatprep.subr.bf16.mxu0 %v3519_v15  ;;  %v3477_v49 = vpop.eup %3476 }
0x1123   : > { %v2031_v51 = vmul.f32 %v3477_v49, %v3465_v22 }
0x1124   : > { %3251 = vmatmul.mubr.msk.bf16.vlgmr.msra.gmra.mxu0 %vm769_vm9, %v1912_v47 }
0x1125   : > { %3261 = vmatpush3.bf16.msra.mxu0 %v2035_v45  ;;  %3262 = vmatprep.mubr.msk.bf16.mxu0 %vm3520_vm1, %v3519_v15 }
0x1126   : > { %v3479_v50 = vpop.eup %3478  ;;  %3272 = vmatprep.subr.bf16.mxu0 %v3519_v15 }
0x1127   : > { %v2032_v0 = vmul.f32 %v3479_v50, %v3467_v24 }
0x1129   : > { %v2033_v52 = vpack.c.bf16 %v2032_v0, %v2031_v51 }
0x112a   : > { %v3481_v1 = vpop.eup %3480 }
0x112b   : > { %v2154_v56 = vmul.f32 %v3481_v1, %v3469_v26  ;;  %v3395_v1 = vld [vmem:[%s4225_s11 + $0x10] sm:$0xff]  }
0x112c   : > { %3263 = vmatmul.mubr.msk.bf16.vlgmr.msra.gmra.mxu0 %vm769_vm9, %v2033_v52 }
0x112d   : > { %3274 = vmatprep.mubr.msk.bf16.mxu0 %vm3520_vm1, %v3519_v15 }
0x114d   : > { %v2151_v53 = vpop.xlane.xlu1 %2150 }
0x114e   : > { %3482 = vrcp.f32 %v2151_v53 }
0x1151   : > { %v2158_v54 = vpop.permute.xlu1 %2157 }
0x1152   : > { %3273 = vmatpush3.bf16.msra.mxu0 %v2158_v54  ;;  %v3394_v54 = vld [vmem:[%s4225_s11 + $0x18] sm:$0xff]  }
0x1153   : > { %3286 = vmatprep.subr.bf16.mxu0 %v3519_v15 }
0x115b   : > { %v3483_v55 = vpop.eup %3482 }
0x115c   : > { %v2155_v57 = vmul.f32 %v3483_v55, %v3471_v31 }
0x115e   : > { %v2156_v58 = vpack.c.bf16 %v2155_v57, %v2154_v56 }
0x1160   : > { %3275 = vmatmul.mubr.msk.bf16.vlgmr.msra.gmra.mxu0 %vm769_vm9, %v2156_v58 }
0x1161   : > { %3290 = vmatprep.mubr.msk.bf16.mxu0 %vm3520_vm1, %v3519_v15  ;;  %3287 = vmatpush3.bf16.msra.mxu0 %v3394_v54 }
0x1162   : > { %3288 = vmatprep.subr.bf16.mxu0 %v3519_v15 }
0x1165   : > { %3289 = vmatpush3.bf16.msra.mxu0 %v3395_v1 }
0x1166   : > { %3314 = vmatprep.subr.mxu0 %v3519_v15 }
0x11e4   : > { %v1953_v62 = vpop.f32.mrf.mxu0 }
0x11e6   : > { %v3252_v63 = vpop.f32.mrf.mxu0 }
0x11e8   : > { %v1956_v2 = vpop.f32.mrf.mxu0 }
0x11e9   : > { %v3361_v7 = vpack.i.bf16 %v1956_v2, %v1953_v62 }
0x11ea   : > { %v3253_v8 = vpop.f32.mrf.mxu0 }
0x11eb   : > { %3362 = vrot.lane.b32.xlu0 %v3361_v7, %s4258_s23  ;;  %v2959_v7 = vld [vmem:[%s4223_s9 + $0x1] ss:$0 sm:$0xff]  ;;  %s2638_s23 = sadd.s32 3, %s4121_s1 }
0x11ec   : > { %v2074_v10 = vpop.f32.mrf.mxu0  ;;  %s4127_s30 = sld [smem:[#allocation3 + %s2638_s23]] }
0x11ed   : > { %s4137_s23 = sld [smem:[#allocation3 + %s2671_s21]]  ;;  %s4266_s21 = smov 96  }
0x11ee   : > { %v3264_v6 = vpop.f32.mrf.mxu0 }
0x11f0   : > { %v2077_v43 = vpop.f32.mrf.mxu0 }
0x11f1   : > { %v3366_v11 = vpack.i.bf16 %v2077_v43, %v2074_v10  ;;  %v2960_v43 = vld [vmem:[%s4253_s22 + $0x1] ss:$0 sm:$0xff] }
0x11f2   : > { %v3265_v12 = vpop.f32.mrf.mxu0  ;;  %p2640_p0 = scmp.gt.s32.totalorder %s4127_s30, 0  ;;  %p3014_p3 = scmp.lt.s32.totalorder %s4127_s30, 15 }
0x11f3   : > { %3367 = vrot.lane.b32.xlu1 %v3366_v11, %s4259_s24  ;;  %s2628_s24 = sld [smem:[#allocation3 + %s2627_s28]]  ;;  %p2673_p7 = scmp.gt.s32.totalorder %s4137_s23, 0 }
0x11f4   : > { %s4134_s28 = sld [smem:[#allocation3 + %s2660_s19]]  ;;  %p3029_p8 = scmp.lt.s32.totalorder %s4137_s23, 15 }
0x11f5   : > { %s4282_s23 = smov (!%p2673_p7, %s4137_s23), 0 }
0x11f6   : > { %s4288_s23 = smov (!%p3029_p8, %s4282_s23), 15 }
0x11f9   : > { %p2629_p13 = scmp.gt.s32.totalorder %s2628_s24, 0  ;;  %p3009_p1 = scmp.lt.s32.totalorder %s2628_s24, 15 }
0x11fa   : > { %p2662_p5 = scmp.gt.s32.totalorder %s4134_s28, 0  ;;  %p3024_p6 = scmp.lt.s32.totalorder %s4134_s28, 15 }
0x11fb   : > { %s4274_s24 = smov (!%p2629_p13, %s2628_s24), 0 }
0x11fc   : > { %s4276_s24 = smov (!%p3009_p1, %s4274_s24), 15 }
0x11fd   : > { %s2663_s1 = scalar_select %p2662_p5, %s4134_s28, 0 }
0x11fe   : > { %s2893_s28 = sshll.u32 %s3640_s10, 1 }
0x11ff   : > { %s4284_s1 = smov (!%p3024_p6, %s2663_s1), 15 }
0x1220   : > { %v2197_v48 = vpop.f32.mrf.mxu0 }
0x1222   : > { %v3276_v9 = vpop.f32.mrf.mxu0 }
0x1223   : > { %v3396_v9 = vld [vmem:[%s4227_s13 + $0x78] sm:$0xff]  }
0x1224   : > { %v2200_v14 = vpop.f32.mrf.mxu0 }
0x1225   : > { %v3371_v16 = vpack.i.bf16 %v2200_v14, %v2197_v48  ;;  %v3397_v14 = vld [vmem:[%s4227_s13 + $0x70] sm:$0xff]  }
0x1226   : > { %v3277_v17 = vpop.f32.mrf.mxu0 }
0x1227   : > { %3372 = vrot.lane.b32.xlu0 %v3371_v16, %s4260_s26  ;;  %v3398_v16 = vld [vmem:[%s4227_s13 + $0x68] sm:$0xff]   ;;  %v3399_v17 = vld [vmem:[%s4227_s13 + $0x60] sm:$0xff]   ;;  %s4130_s26 = sld [smem:[#allocation3 + %s2649_s0]] }
0x1228   : > { %s2641_s0 = scalar_select %p2640_p0, %s4127_s30, 0 }
0x122a   : > { %s4278_s0 = smov (!%p3014_p3, %s2641_s0), 15 }
0x122d   : > { %p2651_p2 = scmp.gt.s32.totalorder %s4130_s26, 0  ;;  %p3019_p4 = scmp.lt.s32.totalorder %s4130_s26, 15 }
0x122f   : > { %s2652_s19 = scalar_select %p2651_p2, %s4130_s26, 0 }
0x1230   : > { %s3533_s26 = smov 32  }
0x1231   : > { %s4280_s19 = smov (!%p3019_p4, %s2652_s19), 15 }
0x125d   : > { %v3363_v18 = vpop.permute.xlu0 %3362 }
0x125e   : > { %v3365_v20 = vunpack.i.h.bf16 %v3363_v18  ;;  %v3364_v21 = vunpack.i.l.bf16 %v3363_v18  ;;  %v3400_v18 = vld [vmem:[%s4227_s13 + $0x58] sm:$0xff]  }
0x1260   : > { %v2229_v25 = vsel %vm718_vm3, %v3969_v34, %v3365_v20  ;;  %v2228_v26 = vsel %vm718_vm3, %v3967_v32, %v3364_v21  ;;  %v2956_v32 = vld [vmem:[%s4222_s8 + $0x1] ss:$0 sm:$0xff]  ;;  %v3402_v20 = vld [vmem:[%s4227_s13 + $0x48] sm:$0xff]   ;;  %vm2633_vm3 = vcmp.eq.s32.totalorder %v3720_v61, 2 }
0x1261   : > { %v3403_v21 = vld [vmem:[%s4227_s13 + $0x40] sm:$0xff]  }
0x1265   : > { %v3368_v19 = vpop.permute.xlu1 %3367 }
0x1266   : > { %v3370_v22 = vunpack.i.h.bf16 %v3368_v19  ;;  %v3369_v23 = vunpack.i.l.bf16 %v3368_v19  ;;  %v3401_v19 = vld [vmem:[%s4227_s13 + $0x50] sm:$0xff]  }
0x1268   : > { %v2231_v29 = vsel %vm769_vm9, %v2229_v25, %v3370_v22  ;;  %v2230_v30 = vsel %vm769_vm9, %v2228_v26, %v3369_v23  ;;  %v2966_v22 = vld [vmem:[%s4226_s12 + $0x1] ss:$0 sm:$0xff] }
0x1299   : > { %v3373_v24 = vpop.permute.xlu0 %3372 }
0x129a   : > { %v3375_v27 = vunpack.i.h.bf16 %v3373_v24  ;;  %v3374_v28 = vunpack.i.l.bf16 %v3373_v24 }
0x129c   : > { %v2233_v31 = vsel %vm1236_vm11, %v2231_v29, %v3375_v27  ;;  %v2232_v33 = vsel %vm1236_vm11, %v2230_v30, %v3374_v28 }
0x129d   : > { %v2234_v35 = vpack.c.bf16 %v2233_v31, %v2232_v33 }
0x129f   : > { %3283 = vmatmul.mubr.msk.bf16.vlgmr.msra.gmra.mxu1 %vm563_vm0, %v2234_v35 }
0x12a0   : > { %3310 = vmatprep.mubr.msk.bf16.mxu1 %vm3520_vm1, %v3519_v15  ;;  %3295 = vmatpush3.bf16.msra.mxu1 %v3396_v9 }
0x12a1   : > { %3296 = vmatprep.subr.bf16.mxu1 %v3519_v15 }
0x12a4   : > { %3297 = vmatpush3.bf16.msra.mxu1 %v3397_v14 }
0x12a5   : > { %3298 = vmatprep.subr.bf16.mxu1 %v3519_v15 }
0x12a8   : > { %3299 = vmatpush3.bf16.msra.mxu1 %v3398_v16  ;;  %v2634_v16 = vstv %s4276_s24 }
0x12a9   : > { %3300 = vmatprep.subr.bf16.mxu1 %v3519_v15  ;;  %vm2635_vm4 = vcmp.eq.s32.totalorder %v3724_v3, %v2634_v16 }
0x12aa   : > { %vm2636_vm5 = vmand %vm2633_vm3, %vm2635_vm4  ;;  %vm2688_vm4 = vcmp.eq.s32.totalorder %v3720_v61, 7 }
0x12ac   : > { %3301 = vmatpush3.bf16.msra.mxu1 %v3399_v17 }
0x12ad   : > { %3302 = vmatprep.subr.bf16.mxu1 %v3519_v15 }
0x12b0   : > { %3303 = vmatpush3.bf16.msra.mxu1 %v3400_v18 }
0x12b1   : > { %3304 = vmatprep.subr.bf16.mxu1 %v3519_v15 }
0x12b4   : > { %3305 = vmatpush3.bf16.msra.mxu1 %v3401_v19 }
0x12b5   : > { %3306 = vmatprep.subr.bf16.mxu1 %v3519_v15 }
0x12b8   : > { %3307 = vmatpush3.bf16.msra.mxu1 %v3402_v20  ;;  %v2645_v20 = vstv %s4278_s0  ;;  %s540_s0 = scalar_lea.vmem %s4231_s17, %s2893_s28 }
0x12b9   : > { %3308 = vmatprep.subr.bf16.mxu1 %v3519_v15  ;;  %vm2646_vm7 = vcmp.eq.s32.totalorder %v3724_v3, %v2645_v20 }
0x12ba   : > { %vm2647_vm8 = vmand %vm2644_vm6, %vm2646_vm7  ;;  %vm2796_vm7 = vcmask 785408  }
0x12bc   : > { %3309 = vmatpush3.bf16.msra.mxu1 %v3403_v21 }
0x135f   : > { %v2289_v34 = vpop.f32.mrf.mxu1 }
0x1360   : > { %v2296_v36 = vadd.f32 %v2289_v34, %v3889_v60 }
0x1361   : > { %v3284_v37 = vpop.f32.mrf.mxu1 }
0x1362   : > { %v4039_v41 = vadd.f32 %v2956_v32, %v2296_v36 }
0x1363   : > { %v2292_v38 = vpop.f32.mrf.mxu1 }
0x1364   : > { %v2297_v39 = vadd.f32 %v2292_v38, %v3894_v5  ;;  %v2312_v40 = vsel %vm563_vm0, %v4039_v41, 0.0 }
0x1365   : > { %2313 = vadd.xlane.f32.xlu1 %v2312_v40  ;;  %v3285_v42 = vpop.f32.mrf.mxu1 }
0x1366   : > { %v4044_v44 = vadd.f32 %v2956_v32, %v2297_v39 }
0x1368   : > { %v2315_v46 = vsel %vm563_vm0, %v4044_v44, 0.0 }
0x1369   : > { %2316 = vadd.xlane.f32.xlu0 %v2315_v46 }
0x13ee   : > { %v2314_v47 = vpop.xlane.xlu1 %2313 }
0x13ef   : > { %v2318_v49 = vmul.f32 0.03125, %v2314_v47 }
0x13f1   : > { %v2320_v60 = vsub.f32 %v4039_v41, %v2318_v49 }
0x13f2   : > { %v2317_v45 = vpop.xlane.xlu0 %2316 }
0x13f3   : > { %v2319_v50 = vmul.f32 0.03125, %v2317_v45  ;;  %v2322_v51 = vmul.f32 %v2320_v60, %v2320_v60 }
0x13f5   : > { %v2321_v5 = vsub.f32 %v4044_v44, %v2319_v50  ;;  %v2324_v0 = vsel %vm563_vm0, %v2322_v51, 0.0 }
0x13f6   : > { %2325 = vadd.xlane.f32.xlu0 %v2324_v0 }
0x13f7   : > { %v2323_v52 = vmul.f32 %v2321_v5, %v2321_v5 }
0x13f9   : > { %v2327_v53 = vsel %vm563_vm0, %v2323_v52, 0.0 }
0x13fa   : > { %2328 = vadd.xlane.f32.xlu1 %v2327_v53 }
0x147f   : > { %v2326_v55 = vpop.xlane.xlu0 %2325 }
0x1480   : > { %v2330_v56 = vmul.f32 0.03125, %v2326_v55 }
0x1482   : > { %v2332_v57 = vadd.f32 1e-05, %v2330_v56 }
0x1483   : > { %v2329_v58 = vpop.xlane.xlu1 %2328 }
0x1484   : > { %3484 = vrsqrt.f32 %v2332_v57  ;;  %v2331_v62 = vmul.f32 0.03125, %v2329_v58 }
0x1486   : > { %v2333_v63 = vadd.f32 1e-05, %v2331_v62 }
0x1488   : > { %3486 = vrsqrt.f32 %v2333_v63 }
0x1491   : > { %v3485_v2 = vpop.eup %3484 }
0x1492   : > { %v2336_v4 = vmul.f32 %v3485_v2, %v2320_v60 }
0x1494   : > { %v2344_v6 = vmul.f32 %v2959_v7, %v2336_v4 }
0x1495   : > { %v3487_v8 = vpop.eup %3486 }
0x1496   : > { %v2337_v10 = vmul.f32 %v3487_v8, %v2321_v5  ;;  %v2352_v12 = vadd.f32 %v2960_v43, %v2344_v6  ;;  %v2995_v5 = vld [vmem:[%s4228_s14 + $0x1] ss:$0 sm:$0xff] }
0x1498   : > { %v2345_v11 = vmul.f32 %v2959_v7, %v2337_v10 }
0x149a   : > { %v2353_v13 = vadd.f32 %v2960_v43, %v2345_v11  ;;  %v2612_v43 = vstv %s4270_s18  ;;  %s4265_s18 = smov 64  }
0x149b   : > { %vm2613_vm13 = vcmp.eq.s32.totalorder %v3724_v3, %v2612_v43 }
0x149c   : > { %v2354_v48 = vpack.c.bf16 %v2353_v13, %v2352_v12  ;;  %v2623_v13 = vstv %s4272_s27  ;;  %vm2614_vm15 = vmand %vm2611_vm12, %vm2613_vm13  ;;  %vm2666_vm13 = vcmp.eq.s32.totalorder %v3720_v61, 5 }
0x149d   : > { %v2615_v18 = vsel %vm2614_vm15, 1.0, %v3519_v15 }
0x149e   : > { %3291 = vmatmul.mubr.msk.bf16.vlgmr.msra.gmra.mxu0 %vm563_vm0, %v2354_v48 }
0x149f   : > { %3318 = vmatprep.mubr.msk.f32.mxu0 %vm3520_vm1, %v3519_v15  ;;  %vm2624_vm1 = vcmp.eq.s32.totalorder %v3724_v3, %v2623_v13 }
0x14a0   : > { %vm4158_vm2 = vmand %vm2622_vm14, %vm2624_vm1  ;;  %vm2677_vm1 = vcmp.eq.s32.totalorder %v3720_v61, 6 }
0x14a1   : > { %v2626_v21 = vsel %vm4158_vm2, 1.0, %v2615_v18 }
0x155e   : > { %v2417_v23 = vpop.f32.mrf.mxu0 }
0x155f   : > { %v2418_v24 = vadd.f32 %v2966_v22, %v2417_v23  ;;  %v2637_v23 = vsel %vm2636_vm5, 1.0, %v2626_v21 }
0x1560   : > { %v3292_v25 = vpop.f32.mrf.mxu0 }
0x1561   : > { %v2426_v26 = vmul.f32 0.044715, %v2418_v24  ;;  %v2424_v46 = vmul.f32 0.5, %v2418_v24  ;;  %v2648_v25 = vsel %vm2647_vm8, 1.0, %v2637_v23  ;;  %vm2821_vm8 = vcmp.lt.s32.totalorder %v546_v59, 256 }
0x1562   : > { %v2420_v27 = vpop.f32.mrf.mxu0 }
0x1563   : > { %v2428_v28 = vmul.f32 %v2426_v26, %v2418_v24  ;;  %v2421_v29 = vadd.f32 %v2966_v22, %v2420_v27  ;;  %v2656_v22 = vstv %s4280_s19  ;;  %v2678_v26 = vstv %s4288_s23 }
0x1564   : > { %v3293_v30 = vpop.f32.mrf.mxu0  ;;  %vm2657_vm11 = vcmp.eq.s32.totalorder %v3724_v3, %v2656_v22  ;;  %vm2679_vm2 = vcmp.eq.s32.totalorder %v3724_v3, %v2678_v26 }
0x1565   : > { %v2430_v31 = vmul.f32 %v2428_v28, %v2418_v24  ;;  %v2427_v33 = vmul.f32 0.044715, %v2421_v29  ;;  %v2425_v47 = vmul.f32 0.5, %v2421_v29  ;;  %vm2658_vm12 = vmand %vm2655_vm10, %vm2657_vm11  ;;  %v2689_v30 = vstv %s4290_s25 }
0x1566   : > { %v2659_v28 = vsel %vm2658_vm12, 1.0, %v2648_v25  ;;  %vm2680_vm3 = vmand %vm2677_vm1, %vm2679_vm2  ;;  %vm2690_vm5 = vcmp.eq.s32.totalorder %v3724_v3, %v2689_v30 }
0x1567   : > { %v2432_v35 = vadd.f32 %v2430_v31, %v2418_v24  ;;  %v2429_v34 = vmul.f32 %v2427_v33, %v2421_v29  ;;  %v2667_v24 = vstv %s4284_s1  ;;  %vm2691_vm6 = vmand %vm2688_vm4, %vm2690_vm5 }
0x1568   : > { %vm2668_vm14 = vcmp.eq.s32.totalorder %v3724_v3, %v2667_v24 }
0x1569   : > { %v2434_v32 = vmul.f32 0.7978846, %v2432_v35  ;;  %v2431_v36 = vmul.f32 %v2429_v34, %v2421_v29  ;;  %vm4179_vm15 = vmand %vm2666_vm13, %vm2668_vm14  ;;  %v2996_v35 = vld [vmem:[%s4229_s15] ss:$0 sm:$0xff] }
0x156b   : > { %3488 = vtanh.f32 %v2434_v32  ;;  %v2433_v37 = vadd.f32 %v2431_v36, %v2421_v29  ;;  %v2670_v32 = vsel %vm4179_vm15, 1.0, %v2659_v28 }
0x156d   : > { %v2435_v38 = vmul.f32 0.7978846, %v2433_v37 }
0x156f   : > { %3490 = vtanh.f32 %v2435_v38  ;;  %v2997_v38 = vld [vmem:[%s4230_s16] ss:$0 sm:$0xff] }
0x1578   : > { %v3489_v39 = vpop.eup %3488 }
0x1579   : > { %v2438_v40 = vadd.f32 1.0, %v3489_v39  ;;  %v2681_v39 = vsel %vm2680_vm3, 1.0, %v2670_v32 }
0x157b   : > { %v2440_v60 = vmul.f32 %v2438_v40, %v2424_v46  ;;  %v2692_v46 = vsel %vm2691_vm6, 1.0, %v2681_v39 }
0x157c   : > { %v3491_v42 = vpop.eup %3490 }
0x157d   : > { %v2439_v49 = vadd.f32 1.0, %v3491_v42 }
0x157f   : > { %v2441_v45 = vmul.f32 %v2439_v49, %v2425_v47 }
0x1581   : > { %v2442_v50 = vpack.c.bf16 %v2441_v45, %v2440_v60 }
0x1583   : > { %3311 = vmatmul.mubr.bf16.vlgmr.msra.gmra.mxu1 %v2442_v50 }
0x1643   : > { %v2542_v51 = vpop.f32.mrf.mxu1 }
0x1644   : > { %v2549_v0 = vadd.f32 %v2542_v51, %v4039_v41 }
0x1645   : > { %v3312_v52 = vpop.f32.mrf.mxu1 }
0x1646   : > { %v2559_v53 = vadd.f32 %v2995_v5, %v2549_v0  ;;  %v3534_v52 = vmov 1966171168  }
0x1647   : > { %v2545_v54 = vpop.f32.mrf.mxu1 }
0x1648   : > { %v2550_v1 = vadd.f32 %v2545_v54, %v4044_v44  ;;  %v2563_v55 = vsel %vm563_vm0, %v2559_v53, 0.0 }
0x1649   : > { %2564 = vadd.xlane.f32.xlu1 %v2563_v55  ;;  %v3313_v56 = vpop.f32.mrf.mxu1 }
0x164a   : > { %v2560_v57 = vadd.f32 %v2995_v5, %v2550_v1 }
0x164c   : > { %v2566_v58 = vsel %vm563_vm0, %v2560_v57, 0.0 }
0x164d   : > { %2567 = vadd.xlane.f32.xlu0 %v2566_v58 }
0x16d2   : > { %v2565_v62 = vpop.xlane.xlu1 %2564 }
0x16d3   : > { %v2569_v63 = vmul.f32 0.03125, %v2565_v62 }
0x16d5   : > { %v4110_v2 = vsub.f32 %v2559_v53, %v2569_v63  ;;  %v2805_v53 = vunpack.c.l.s4 %v3534_v52 }
0x16d6   : > { %v2568_v4 = vpop.xlane.xlu0 %2567 }
0x16d7   : > { %v2570_v41 = vmul.f32 0.03125, %v2568_v4  ;;  %v2573_v7 = vmul.f32 %v4110_v2, %v4110_v2  ;;  %v2806_v55 = vunpack.c.0.s8 %v2805_v53 }
0x16d9   : > { %v4114_v8 = vsub.f32 %v2560_v57, %v2570_v41  ;;  %v2575_v44 = vsel %vm563_vm0, %v2573_v7, 0.0  ;;  %v2809_v41 = vsub.s32 %v2806_v55, %v3720_v61 }
0x16da   : > { %2576 = vadd.xlane.f32.xlu1 %v2575_v44 }
0x16db   : > { %v2574_v10 = vmul.f32 %v4114_v8, %v4114_v8 }
0x16dd   : > { %v2578_v6 = vsel %vm563_vm0, %v2574_v10, 0.0 }
0x16de   : > { %2579 = vadd.xlane.f32.xlu0 %v2578_v6 }
0x1763   : > { %v2577_v11 = vpop.xlane.xlu1 %2576 }
0x1764   : > { %v2581_v12 = vmul.f32 0.03125, %v2577_v11 }
0x1766   : > { %v2583_v48 = vadd.f32 1e-05, %v2581_v12 }
0x1767   : > { %v2580_v9 = vpop.xlane.xlu0 %2579 }
0x1768   : > { %3492 = vrsqrt.f32 %v2583_v48  ;;  %v2582_v14 = vmul.f32 0.03125, %v2580_v9 }
0x176a   : > { %v2584_v17 = vadd.f32 1e-05, %v2582_v14 }
0x176c   : > { %3494 = vrsqrt.f32 %v2584_v17 }
0x1775   : > { %v3493_v27 = vpop.eup %3492 }
0x1776   : > { %v2587_v31 = vmul.f32 %v3493_v27, %v4110_v2 }
0x1778   : > { %v2595_v37 = vmul.f32 %v2996_v35, %v2587_v31 }
0x1779   : > { %v3495_v33 = vpop.eup %3494 }
0x177a   : > { %v2588_v34 = vmul.f32 %v3495_v33, %v4114_v8  ;;  %v2603_v42 = vadd.f32 %v2997_v38, %v2595_v37 }
0x177c   : > { %v2596_v36 = vmul.f32 %v2996_v35, %v2588_v34 }
0x177e   : > { %v2604_v40 = vadd.f32 %v2997_v38, %v2596_v36 }
0x1780   : > { %3315 = vmatpush3.msra.mxu0 %v2604_v40 }
0x1781   : > { %3316 = vmatprep.subr.mxu0 %v3519_v15 }
0x1782   : > { %3317 = vmatpush3.msra.mxu0 %v2603_v42 }
0x1783   : > { %3319 = vmatmul.mubr.msk.f32.vlgmr.msra.gmra.mxu0 %vm769_vm9, %v2692_v46  ;;  %vm2794_vm9 = vcmask 523264  }
0x1843   : > { %v2762_v47 = vpop.f32.mrf.mxu0 }
0x1844   : > { %v2771_v49 = vrot.slane %v2762_v47, 2  ;;  %v2767_v3 = vrot.slane %v2762_v47, 1  ;;  %v2775_v45 = vrot.slane %v2762_v47, 3  ;;  %v2781_v50 = vrot.slane %v2762_v47, 5 }
0x1845   : > { %v3320_v60 = vpop.f32.mrf.mxu0  ;;  %v2785_v51 = vrot.slane %v2762_v47, 6  ;;  %v2789_v5 = vrot.slane %v2762_v47, 7  ;;  %v2779_v57 = vrot.slane %v2762_v47, 4 }
0x1846   : > { %2772 = vrot.lane.b32.xlu1 %v2771_v49, %s4265_s18  ;;  %2768 = vrot.lane.b32.xlu0 %v2767_v3, %s3533_s26 }
0x184a   : > { %2776 = vrot.lane.b32.xlu1 %v2775_v45, %s4266_s21  ;;  %2782 = vrot.lane.b32.xlu0 %v2781_v50, %s3533_s26 }
0x184e   : > { %2786 = vrot.lane.b32.xlu1 %v2785_v51, %s4265_s18  ;;  %2790 = vrot.lane.b32.xlu0 %v2789_v5, %s4266_s21 }
0x18b8   : > { %v2773_v15 = vpop.permute.xlu1 %2772  ;;  %v2769_v0 = vpop.permute.xlu0 %2768 }
0x18b9   : > { %v2793_v56 = vsel %vm563_vm0, %v2762_v47, %v2769_v0 }
0x18ba   : > { %v2795_v2 = vsel %vm2794_vm9, %v2793_v56, %v2773_v15 }
0x18bc   : > { %v2777_v54 = vpop.permute.xlu1 %2776  ;;  %v2783_v1 = vpop.permute.xlu0 %2782 }
0x18bd   : > { %v2798_v58 = vsel %vm563_vm0, %v2779_v57, %v2783_v1  ;;  %v2797_v7 = vsel %vm2796_vm7, %v2795_v2, %v2777_v54 }
0x18c0   : > { %v2787_v62 = vpop.permute.xlu1 %2786  ;;  %v2791_v63 = vpop.permute.xlu0 %2790 }
0x18c1   : > { %v2799_v4 = vsel %vm2794_vm9, %v2798_v58, %v2787_v62 }
0x18c2   : > { %v2800_v8 = vsel %vm2796_vm7, %v2799_v4, %v2791_v63 }
0x18c3   : > { %v2803_v44 = vcombine.low %v2797_v7, %v2800_v8 }
0x18c5   : > { %v2810_v10 = vrot.slane %v2803_v44, %v2809_v41 }
0x18c7   : > { %v2817_v6 = vrot.slane %v2810_v10, %v2809_v41 }
0x18c9   : > { %2823 = vst.msk [vmem:[%s540_s0] sm:$0x3] %vm2821_vm8, %v2817_v6 }
0x18ca PF: > { %s33_s29 = sadd.s32 1, %s3516_s29  }
0x18cb   : > { %p30_p11 = scmp.ge.s32.totalorder %s33_s29, 4  }
0x18cd   :  { %32 = sbr.rel (!%p30_p11) target bundleno = 25 (0x19), region = 129 }

</bundles_post_ra>
